<compile_context>
chip_gen: v7x
topology: tpu7x:2x2x1
jax: 0.10.0
libtpu: 0.0.40
codegen_flags: <defaults>
</compile_context>

<pallas_src>
import numpy as np
import jax
import jax.numpy as jnp
from jax.experimental import pallas as pl
from jax.experimental.pallas import tpu as pltpu


IN_H = IN_W = 28
K = 3
OUT_H = OUT_W = IN_H - K + 1          # 26
N_IN = IN_H * IN_W                    # 784
N_CONV = OUT_H * OUT_W                # 676
N_HID = 100
N_OUT = 10
LANE = 128                            # padded width for the 100 / 10 dims


def _round_up(x, m):
    return (x + m - 1) // m * m


# ----------------------------- kernel ----------------------------------------

def fused_kernel(x_ref, wc_ref, bc_ref, w1_ref, b1_ref, w2_ref, b2_ref, o_ref):
    # x_ref : (bt, 784)  f32     wc_ref: (784, 676) bf16   bc_ref: (1, 676) f32
    # w1_ref: (676, 128) bf16    b1_ref: (1, 128)   f32
    # w2_ref: (128, 128) bf16    b2_ref: (1, 128)   f32
    # o_ref : (bt, 128)  f32
    # bf16 operands feed the MXU at native rate on v5e/v6e/v7x; accumulation
    # and all elementwise work (bias add, tanh) stay f32 (v5e-safe).
    x = x_ref[...].astype(jnp.bfloat16)
    h = jnp.tanh(
        jnp.dot(x, wc_ref[...], preferred_element_type=jnp.float32)
        + bc_ref[...])
    a1 = jnp.tanh(
        jnp.dot(h.astype(jnp.bfloat16), w1_ref[...],
                preferred_element_type=jnp.float32) + b1_ref[...])
    o_ref[...] = jnp.tanh(
        jnp.dot(a1.astype(jnp.bfloat16), w2_ref[...],
                preferred_element_type=jnp.float32) + b2_ref[...])


# ----------------------------- parameter prep (one-time) ---------------------

def prepare_params(params):
    """One-time host-side prep (NOT in the per-call path):
      * fold the 3x3 'valid' conv (1->1 ch, 28x28 -> 26x26) into a dense
        (784, 676) matrix, stored bf16 (its zeros stay exact, DMA is halved),
      * pre-transpose the FC weights and store them bf16,
      * zero-pad the 100/10 trailing dims to 128 (lane-dense stores),
      * keep biases f32 (they are added to the f32 MXU accumulator)."""
    wc, bc, w1, b1, w2, b2 = params
    wc_np = np.asarray(wc, dtype=np.float32)

    w_conv = np.zeros((N_IN, N_CONV), dtype=np.float32)
    for dy in range(K):
        for dx in range(K):
            w = wc_np[dy, dx]
            for r in range(OUT_H):
                for c in range(OUT_W):
                    # output index r*26 + c matches torch's x.view(-1, 26*26)
                    w_conv[(r + dy) * IN_W + (c + dx), r * OUT_W + c] += w
    # TODO(synk): for tiny batches the conv could instead be a 3-band
    # decomposition (3 skinny matmuls) to shrink DMA and padded-K waste further.

    b_conv = np.full((1, N_CONV), float(np.asarray(bc).reshape(-1)[0]),
                     dtype=np.float32)

    w1t = np.zeros((N_CONV, LANE), dtype=np.float32)
    w1t[:, :N_HID] = np.asarray(w1, dtype=np.float32).T
    b1p = np.zeros((1, LANE), dtype=np.float32)
    b1p[0, :N_HID] = np.asarray(b1, dtype=np.float32).reshape(-1)

    w2t = np.zeros((LANE, LANE), dtype=np.float32)
    w2t[:N_HID, :N_OUT] = np.asarray(w2, dtype=np.float32).T
    b2p = np.zeros((1, LANE), dtype=np.float32)
    b2p[0, :N_OUT] = np.asarray(b2, dtype=np.float32).reshape(-1)

    return (jnp.asarray(w_conv, dtype=jnp.bfloat16),
            jnp.asarray(b_conv),
            jnp.asarray(w1t, dtype=jnp.bfloat16),
            jnp.asarray(b1p),
            jnp.asarray(w2t, dtype=jnp.bfloat16),
            jnp.asarray(b2p))


# ----------------------------- wrapper ----------------------------------------

_rep = lambda i: (0, 0)   # resident blocks: same block on every grid step


def _resident_spec(shape):
    """Weights/biases never change across the batch grid: single-buffer them."""
    try:
        return pl.BlockSpec(shape, _rep, pipeline_mode=pl.Buffered(1))
    except TypeError:  # older jax without pipeline_mode: default buffering
        return pl.BlockSpec(shape, _rep)


def _pick_batch_tile(B):
    """>=2 grid steps when B > 8 (both v7x TensorCores get work), tile capped
    at 512 (VMEM-safe on all generations), prefer exact divisors of B so the
    padded-x copy is avoided for large batches."""
    if B <= 8:
        return 8
    bt = min(512, _round_up((B + 1) // 2, 8))
    for cand in (512, 256, 128, 64, 32, 16, 8):
        if cand <= bt and cand >= max(8, bt // 2) and B % cand == 0:
            return cand
    return bt


def network_forward(x_nchw, prepared):
    """x_nchw: (B, 1, 28, 28) f32.  Returns (B, 10) f32."""
    w_conv, b_conv, w1t, b1p, w2t, b2p = prepared
    B = x_nchw.shape[0]
    # NCHW with C=1 flattens row-major over (H, W): matches torch layout.
    x = x_nchw.reshape(B, N_IN)

    bt = _pick_batch_tile(B)
    Bp = _round_up(B, bt)
    if Bp != B:
        x = jnp.pad(x, ((0, Bp - B), (0, 0)))

    out = pl.pallas_call(
        fused_kernel,
        out_shape=jax.ShapeDtypeStruct((Bp, LANE), jnp.float32),
        grid_spec=pltpu.PrefetchScalarGridSpec(
            num_scalar_prefetch=0,
            grid=(Bp // bt,),
            in_specs=[
                pl.BlockSpec((bt, N_IN), lambda i: (i, 0)),
                _resident_spec((N_IN, N_CONV)),
                _resident_spec((1, N_CONV)),
                _resident_spec((N_CONV, LANE)),
                _resident_spec((1, LANE)),
                _resident_spec((LANE, LANE)),
                _resident_spec((1, LANE)),
            ],
            out_specs=pl.BlockSpec((bt, LANE), lambda i: (i, 0)),
        ),
        compiler_params=pltpu.CompilerParams(
            dimension_semantics=("parallel",)),
    )(x, w_conv, b_conv, w1t, b1p, w2t, b2p)

    return out[:B, :N_OUT]


# ----------------------------- reference (pure JAX, PyTorch semantics) -------

def network_reference(x_nchw, params):
    wc, bc, w1, b1, w2, b2 = params
    x = x_nchw[:, 0, :, :]
    B = x.shape[0]
    acc = jnp.zeros((B, OUT_H, OUT_W), jnp.float32)
    for dy in range(K):
        for dx in range(K):
            acc = acc + wc[dy, dx] * x[:, dy:dy + OUT_H, dx:dx + OUT_W]
    h = jnp.tanh(acc + bc[0]).reshape(B, N_CONV)
    a1 = jnp.tanh(h @ w1.T + b1)
    return jnp.tanh(a1 @ w2.T + b2)


# ----------------------------- main -------------------------------------------

if __name__ == "__main__":
    key = jax.random.PRNGKey(0)
    kx, kc, kbc, k1, kb1, k2, kb2 = jax.random.split(key, 7)

    B = 4
    # input: NCHW like PyTorch, 28x28 (required so the flatten is 26*26)
    x = jax.random.normal(kx, (B, 1, IN_H, IN_W), dtype=jnp.float32)

    # PyTorch-shaped parameters: Conv2d(1,1,3), Linear(676,100), Linear(100,10)
    wc = jax.random.normal(kc, (K, K), dtype=jnp.float32) * (1.0 / 3.0)
    bc = jax.random.normal(kbc, (1,), dtype=jnp.float32) * 0.1
    w1 = jax.random.normal(k1, (N_HID, N_CONV), dtype=jnp.float32) * (1.0 / np.sqrt(N_CONV))
    b1 = jax.random.normal(kb1, (N_HID,), dtype=jnp.float32) * 0.1
    w2 = jax.random.normal(k2, (N_OUT, N_HID), dtype=jnp.float32) * (1.0 / np.sqrt(N_HID))
    b2 = jax.random.normal(kb2, (N_OUT,), dtype=jnp.float32) * 0.1

    params = (wc, bc, w1, b1, w2, b2)
    prepared = prepare_params(params)      # one-time, outside the call path

    out = jax.block_until_ready(network_forward(x, prepared))
    ref = jax.block_until_ready(network_reference(x, params))

    assert out.shape == (B, N_OUT), out.shape
    # bf16 MXU operands with f32 accumulation: tolerance loosened from the
    # f32-only 1e-4 (per review) while still catching real bugs.
    np.testing.assert_allclose(np.asarray(out), np.asarray(ref),
                               rtol=3e-2, atol=3e-2)
    print("KERNEL_OK")
</pallas_src>

<mosaic_0001>
module attributes {stable_mosaic.version = 11 : i64} {
  func.func @fused_kernel(%arg0: i32, %arg1: memref<8x784xf32, #tpu.memory_space<vmem>>, %arg2: memref<784x676xbf16, #tpu.memory_space<vmem>>, %arg3: memref<1x676xf32, #tpu.memory_space<vmem>>, %arg4: memref<676x128xbf16, #tpu.memory_space<vmem>>, %arg5: memref<1x128xf32, #tpu.memory_space<vmem>>, %arg6: memref<128x128xbf16, #tpu.memory_space<vmem>>, %arg7: memref<1x128xf32, #tpu.memory_space<vmem>>, %arg8: memref<8x128xf32, #tpu.memory_space<vmem>>) attributes {dimension_semantics = [#tpu.dimension_semantics<parallel>], iteration_bounds = array<i64: 1>, scalar_prefetch = 0 : i64, scratch_operands = 0 : i64, tpu.core_type = #tpu.core_type<tc>, window_params = [{transform_indices = @transform_0, window_bounds = array<i64: 8, 784>}, {pipeline_mode = #tpu.pipeline_mode<synchronous>, transform_indices = @transform_1, window_bounds = array<i64: 784, 676>}, {pipeline_mode = #tpu.pipeline_mode<synchronous>, transform_indices = @transform_2, window_bounds = array<i64: 1, 676>}, {pipeline_mode = #tpu.pipeline_mode<synchronous>, transform_indices = @transform_3, window_bounds = array<i64: 676, 128>}, {pipeline_mode = #tpu.pipeline_mode<synchronous>, transform_indices = @transform_4, window_bounds = array<i64: 1, 128>}, {pipeline_mode = #tpu.pipeline_mode<synchronous>, transform_indices = @transform_5, window_bounds = array<i64: 128, 128>}, {pipeline_mode = #tpu.pipeline_mode<synchronous>, transform_indices = @transform_6, window_bounds = array<i64: 1, 128>}, {transform_indices = @transform_7, window_bounds = array<i64: 8, 128>}]} {
    %c0 = arith.constant 0 : index
    %c0_0 = arith.constant 0 : index
    %0 = vector.load %arg1[%c0, %c0_0] : memref<8x784xf32, #tpu.memory_space<vmem>>, vector<8x784xf32>
    %1 = arith.truncf %0 : vector<8x784xf32> to vector<8x784xbf16>
    %c0_1 = arith.constant 0 : index
    %c0_2 = arith.constant 0 : index
    %2 = vector.load %arg2[%c0_1, %c0_2] : memref<784x676xbf16, #tpu.memory_space<vmem>>, vector<784x676xbf16>
    %cst = arith.constant dense<0.000000e+00> : vector<8x676xf32>
    %3 = tpu.matmul %1, %2, %cst {dimension_numbers = #tpu.dot_dimension_numbers<[1], [0], [0], [1], [0, 0, 1, 1], [], []>} : vector<8x784xbf16>, vector<784x676xbf16>, vector<8x676xf32> -> vector<8x676xf32>
    %c0_3 = arith.constant 0 : index
    %c0_4 = arith.constant 0 : index
    %4 = vector.load %arg3[%c0_3, %c0_4] : memref<1x676xf32, #tpu.memory_space<vmem>>, vector<1x676xf32>
    %5 = vector.broadcast %4 : vector<1x676xf32> to vector<8x676xf32>
    %6 = arith.addf %3, %5 : vector<8x676xf32>
    %7 = math.tanh %6 : vector<8x676xf32>
    %8 = arith.truncf %7 : vector<8x676xf32> to vector<8x676xbf16>
    %c0_5 = arith.constant 0 : index
    %c0_6 = arith.constant 0 : index
    %9 = vector.load %arg4[%c0_5, %c0_6] : memref<676x128xbf16, #tpu.memory_space<vmem>>, vector<676x128xbf16>
    %cst_7 = arith.constant dense<0.000000e+00> : vector<8x128xf32>
    %10 = tpu.matmul %8, %9, %cst_7 {dimension_numbers = #tpu.dot_dimension_numbers<[1], [0], [0], [1], [0, 0, 1, 1], [], []>} : vector<8x676xbf16>, vector<676x128xbf16>, vector<8x128xf32> -> vector<8x128xf32>
    %c0_8 = arith.constant 0 : index
    %c0_9 = arith.constant 0 : index
    %11 = vector.load %arg5[%c0_8, %c0_9] : memref<1x128xf32, #tpu.memory_space<vmem>>, vector<1x128xf32>
    %12 = vector.broadcast %11 : vector<1x128xf32> to vector<8x128xf32>
    %13 = arith.addf %10, %12 : vector<8x128xf32>
    %14 = math.tanh %13 : vector<8x128xf32>
    %15 = arith.truncf %14 : vector<8x128xf32> to vector<8x128xbf16>
    %c0_10 = arith.constant 0 : index
    %c0_11 = arith.constant 0 : index
    %16 = vector.load %arg6[%c0_10, %c0_11] : memref<128x128xbf16, #tpu.memory_space<vmem>>, vector<128x128xbf16>
    %cst_12 = arith.constant dense<0.000000e+00> : vector<8x128xf32>
    %17 = tpu.matmul %15, %16, %cst_12 {dimension_numbers = #tpu.dot_dimension_numbers<[1], [0], [0], [1], [0, 0, 1, 1], [], []>} : vector<8x128xbf16>, vector<128x128xbf16>, vector<8x128xf32> -> vector<8x128xf32>
    %c0_13 = arith.constant 0 : index
    %c0_14 = arith.constant 0 : index
    %18 = vector.load %arg7[%c0_13, %c0_14] : memref<1x128xf32, #tpu.memory_space<vmem>>, vector<1x128xf32>
    %19 = vector.broadcast %18 : vector<1x128xf32> to vector<8x128xf32>
    %20 = arith.addf %17, %19 : vector<8x128xf32>
    %21 = math.tanh %20 : vector<8x128xf32>
    %c0_15 = arith.constant 0 : index
    %c0_16 = arith.constant 0 : index
    %22 = vector.load %arg8[%c0_15, %c0_16] : memref<8x128xf32, #tpu.memory_space<vmem>>, vector<8x128xf32>
    tpu.vector_store %arg8[%c0_15, %c0_16], %21 {strides = array<i32>} : memref<8x128xf32, #tpu.memory_space<vmem>>, vector<8x128xf32>,
    return
  }
  func.func @transform_0(%arg0: i32) -> (i32, i32) {
    %c0_i32 = arith.constant 0 : i32
    %c0_i32_0 = arith.constant 0 : i32
    return %arg0, %c0_i32 : i32, i32
  }
  func.func @transform_1(%arg0: i32) -> (i32, i32) {
    %c0_i32 = arith.constant 0 : i32
    %c0_i32_0 = arith.constant 0 : i32
    %c0_i32_1 = arith.constant 0 : i32
    return %c0_i32, %c0_i32_0 : i32, i32
  }
  func.func @transform_2(%arg0: i32) -> (i32, i32) {
    %c0_i32 = arith.constant 0 : i32
    %c0_i32_0 = arith.constant 0 : i32
    %c0_i32_1 = arith.constant 0 : i32
    return %c0_i32, %c0_i32_0 : i32, i32
  }
  func.func @transform_3(%arg0: i32) -> (i32, i32) {
    %c0_i32 = arith.constant 0 : i32
    %c0_i32_0 = arith.constant 0 : i32
    %c0_i32_1 = arith.constant 0 : i32
    return %c0_i32, %c0_i32_0 : i32, i32
  }
  func.func @transform_4(%arg0: i32) -> (i32, i32) {
    %c0_i32 = arith.constant 0 : i32
    %c0_i32_0 = arith.constant 0 : i32
    %c0_i32_1 = arith.constant 0 : i32
    return %c0_i32, %c0_i32_0 : i32, i32
  }
  func.func @transform_5(%arg0: i32) -> (i32, i32) {
    %c0_i32 = arith.constant 0 : i32
    %c0_i32_0 = arith.constant 0 : i32
    %c0_i32_1 = arith.constant 0 : i32
    return %c0_i32, %c0_i32_0 : i32, i32
  }
  func.func @transform_6(%arg0: i32) -> (i32, i32) {
    %c0_i32 = arith.constant 0 : i32
    %c0_i32_0 = arith.constant 0 : i32
    %c0_i32_1 = arith.constant 0 : i32
    return %c0_i32, %c0_i32_0 : i32, i32
  }
  func.func @transform_7(%arg0: i32) -> (i32, i32) {
    %c0_i32 = arith.constant 0 : i32
    %c0_i32_0 = arith.constant 0 : i32
    return %arg0, %c0_i32 : i32, i32
  }
}

</mosaic_0001>

<bundles_post_ra>
// kernel: tpu_custom_call.1
= control target key start
LH: loop header
LB: loop body
LE: loop exit
PB: predicated region body
PF: predicated region fallthrough
CT: control target
= control target key end

     0   :  { %12 = vsyncpa [#allocation3], 0  ;;  %s4437_s0 = inlined_call_operand.hbm [shape: f32[8,784], index: 0, kind: input, shape index: {}]   ;;  %s4438_s1 = inlined_call_operand.hbm [shape: bf16[784,676], index: 1, kind: input, shape index: {}]   ;;  %s4439_s2 = inlined_call_operand.hbm [shape: f32[1,676], index: 2, kind: input, shape index: {}]   ;;  %s4440_s3 = inlined_call_operand.hbm [shape: bf16[676,128], index: 3, kind: input, shape index: {}]   ;;  %s4441_s4 = inlined_call_operand.hbm [shape: f32[1,128], index: 4, kind: input, shape index: {}]   ;;  %s4442_s5 = inlined_call_operand.hbm [shape: bf16[128,128], index: 5, kind: input, shape index: {}]   ;;  %s4443_s6 = inlined_call_operand.hbm [shape: f32[1,128], index: 6, kind: input, shape index: {}]   ;;  %s4444_s7 = inlined_call_operand.hbm [shape: f32[8,128], index: 7, kind: output, shape index: {}]  }
   0x1   :  { %13 = vsyncpa [#allocation6], 0 }
   0x2   :  { %14 = vsyncpa [#allocation9], 0 }
   0x3   :  { %15 = vsyncpa [#allocation12], 0 }
   0x4   :  { %16 = vsyncpa [#allocation4], 0  ;;  %s4212_s24 = smov [#allocation5]   ;;  %s4026_s28 = scalar_lea.hbm %s4438_s1, 37632 }
   0x5   :  { %s32_s25 = sshll.u32 %s4212_s24, 4  ;;  %p4027_p0 = scmp.ne.s32.totalorder %s4438_s1, %s4026_s28  ;;  %s33_s25 = int_to_ptr.vmem [resolvable:$true] %s32_s25 }
   0x6   :  { %p4030_p1 = scmp.lt.u32.totalorder %s4026_s28, %s4438_s1 }
   0x8   :  { %p4032_p2 = pnand %p4030_p1, %p4027_p0 }
   0xa   :  { %4035 = shalt.err (!%p4032_p2)
}
   0xb   :  { %s4036_s10 = scalar_lea.vmem %s33_s25, 37632  ;;  %p4041_p4 = scmp.lt.s32.totalorder %s33_s25, %s33_s25 }
   0xc   :  { %p4037_p3 = scmp.ne.s32.totalorder %s33_s25, %s4036_s10  ;;  %p4042_p5 = scmp.lt.s32.totalorder %s4036_s10, %s4036_s10 }
   0xe   :  { %p4043_p6 = por %p4042_p5, %p4041_p4 }
  0x10   :  { %p4044_p7 = pnand %p4043_p6, %p4037_p3 }
  0x12   :  { %4047 = shalt.err (!%p4044_p7)
}
  0x13   :  { %s4213_s11 = smov 384   ;;  %s4214_s12 = smov 24  }
  0x14   :  { %38 = dma.hbm_to_vmem [thread:$0]  %s4438_s1, 37632, %s33_s25, [#allocation6], %s4213_s11, %s4213_s11, %s4214_s12  }
  0x15   :  { %s4215_s15 = smov [#allocation8]   ;;  %s4048_s19 = scalar_lea.hbm %s4440_s3, 5440 }
  0x16   :  { %s54_s16 = sshll.u32 %s4215_s15, 4  ;;  %p4049_p8 = scmp.ne.s32.totalorder %s4440_s3, %s4048_s19  ;;  %s55_s16 = int_to_ptr.vmem [resolvable:$true] %s54_s16 }
  0x17   :  { %p4052_p9 = scmp.lt.u32.totalorder %s4048_s19, %s4440_s3 }
  0x19   :  { %p4054_p10 = pnand %p4052_p9, %p4049_p8 }
  0x1b   :  { %4057 = shalt.err (!%p4054_p10)
}
  0x1c   :  { %s4058_s24 = scalar_lea.vmem %s55_s16, 5440  ;;  %p4063_p12 = scmp.lt.s32.totalorder %s55_s16, %s55_s16 }
  0x1d   :  { %p4059_p11 = scmp.ne.s32.totalorder %s55_s16, %s4058_s24  ;;  %p4064_p13 = scmp.lt.s32.totalorder %s4058_s24, %s4058_s24 }
  0x1f   :  { %p4065_p0 = por %p4064_p13, %p4063_p12 }
  0x21   :  { %p4066_p1 = pnand %p4065_p0, %p4059_p11 }
  0x23   :  { %4069 = shalt.err (!%p4066_p1)
}
  0x24   :  { %s4216_s1 = smov 64   ;;  %s4217_s25 = smov 4  }
  0x25   :  { %60 = dma.hbm_to_vmem [thread:$0]  %s4440_s3, 5440, %s55_s16, [#allocation9], %s4216_s1, %s4216_s1, %s4217_s25  }
  0x26   :  { %s4218_s28 = smov [#allocation11]   ;;  %s4219_s30 = smov [#allocation2]  }
  0x27   :  { %s76_s29 = sshll.u32 %s4218_s28, 4  ;;  %s23_s8 = sshll.u32 %s4219_s30, 4  ;;  %s77_s29 = int_to_ptr.vmem [resolvable:$true] %s76_s29  ;;  %s24_s8 = int_to_ptr.vmem [resolvable:$true] %s23_s8 }
  0x28   :  { %s4070_s11 = scalar_lea.hbm %s4442_s5, 1024 }
  0x29   :  { %p4071_p2 = scmp.ne.s32.totalorder %s4442_s5, %s4070_s11  ;;  %p4074_p3 = scmp.lt.u32.totalorder %s4070_s11, %s4442_s5 }
  0x2b   :  { %p4076_p4 = pnand %p4074_p3, %p4071_p2 }
  0x2d   :  { %4079 = shalt.err (!%p4076_p4)
}
  0x2e   :  { %s4080_s3 = scalar_lea.vmem %s77_s29, 1024  ;;  %p4085_p6 = scmp.lt.s32.totalorder %s77_s29, %s77_s29 }
  0x2f   :  { %p4081_p5 = scmp.ne.s32.totalorder %s77_s29, %s4080_s3  ;;  %p4086_p7 = scmp.lt.s32.totalorder %s4080_s3, %s4080_s3 }
  0x31   :  { %p4087_p8 = por %p4086_p7, %p4085_p6 }
  0x33   :  { %p4088_p9 = pnand %p4087_p8, %p4081_p5 }
  0x35   :  { %4091 = shalt.err (!%p4088_p9)
}
  0x36   :  { %82 = dma.hbm_to_vmem [thread:$0]  %s4442_s5, 1024, %s77_s29, [#allocation12], %s4216_s1, %s4216_s1, %s4217_s25  }
  0x37   :  { %s4092_s20 = scalar_lea.hbm %s4437_s0, 896 }
  0x38   :  { %p4093_p10 = scmp.ne.s32.totalorder %s4437_s0, %s4092_s20  ;;  %p4096_p11 = scmp.lt.u32.totalorder %s4092_s20, %s4437_s0 }
  0x3a   :  { %p4098_p12 = pnand %p4096_p11, %p4093_p10 }
  0x3c   :  { %4101 = shalt.err (!%p4098_p12)
}
  0x3d   :  { %s4102_s26 = scalar_lea.vmem %s24_s8, 896  ;;  %p4107_p0 = scmp.lt.s32.totalorder %s24_s8, %s24_s8 }
  0x3e   :  { %p4103_p13 = scmp.ne.s32.totalorder %s24_s8, %s4102_s26  ;;  %p4108_p1 = scmp.lt.s32.totalorder %s4102_s26, %s4102_s26 }
  0x40   :  { %p4109_p2 = por %p4108_p1, %p4107_p0 }
  0x42   :  { %p4110_p3 = pnand %p4109_p2, %p4103_p13 }
  0x44   :  { %4113 = shalt.err (!%p4110_p3)
}
  0x45   :  { %26 = dma.hbm_to_vmem [thread:$0]  %s4437_s0, 896, %s24_s8, [#allocation3]  }
  0x46   :  { %s4220_s25 = smov [#allocation7]   ;;  %s4221_s28 = smov [#allocation10]  }
  0x47   :  { %s45_s27 = sshll.u32 %s4220_s25, 4  ;;  %s67_s29 = sshll.u32 %s4221_s28, 4  ;;  %s46_s27 = int_to_ptr.vmem [resolvable:$true] %s45_s27  ;;  %s68_s29 = int_to_ptr.vmem [resolvable:$true] %s67_s29 }
  0x48   :  { %s4114_s10 = scalar_lea.hbm %s4439_s2, 96 }
  0x49   :  { %p4115_p4 = scmp.ne.s32.totalorder %s4439_s2, %s4114_s10  ;;  %p4118_p5 = scmp.lt.u32.totalorder %s4114_s10, %s4439_s2 }
  0x4b   :  { %p4120_p6 = pnand %p4118_p5, %p4115_p4 }
  0x4d   :  { %4123 = shalt.err (!%p4120_p6)
}
  0x4e   :  { %s4124_s0 = scalar_lea.vmem %s46_s27, 96  ;;  %p4129_p8 = scmp.lt.s32.totalorder %s46_s27, %s46_s27 }
  0x4f   :  { %p4125_p7 = scmp.ne.s32.totalorder %s46_s27, %s4124_s0  ;;  %p4130_p9 = scmp.lt.s32.totalorder %s4124_s0, %s4124_s0 }
  0x51   :  { %p4131_p10 = por %p4130_p9, %p4129_p8 }
  0x53   :  { %p4132_p11 = pnand %p4131_p10, %p4125_p7 }
  0x55   :  { %4135 = shalt.err (!%p4132_p11)
}
  0x56   :  { %48 = dma.hbm_to_vmem [thread:$0]  %s4439_s2, 96, %s46_s27, [#allocation6]  }
  0x57   :  { %s4136_s17 = scalar_lea.hbm %s4441_s4, 16 }
  0x58   :  { %p4137_p12 = scmp.ne.s32.totalorder %s4441_s4, %s4136_s17  ;;  %p4140_p13 = scmp.lt.u32.totalorder %s4136_s17, %s4441_s4 }
  0x5a   :  { %p4142_p0 = pnand %p4140_p13, %p4137_p12 }
  0x5c   :  { %4145 = shalt.err (!%p4142_p0)
}
  0x5d   :  { %s4146_s22 = scalar_lea.vmem %s68_s29, 16  ;;  %s4150_s23 = scalar_lea.vmem %s68_s29, 32 }
  0x5e   :  { %p4147_p1 = scmp.ne.s32.totalorder %s68_s29, %s4146_s22  ;;  %p4151_p2 = scmp.lt.s32.totalorder %s68_s29, %s68_s29 }
  0x5f   :  { %p4152_p3 = scmp.lt.s32.totalorder %s4150_s23, %s4146_s22 }
  0x61   :  { %p4153_p4 = por %p4152_p3, %p4151_p2 }
  0x63   :  { %p4154_p5 = pnand %p4153_p4, %p4147_p1 }
  0x65   :  { %4157 = shalt.err (!%p4154_p5)
}
  0x66   :  { %70 = dma.hbm_to_vmem [thread:$0]  %s4441_s4, 16, %s68_s29, [#allocation9]  }
  0x67   :  { %s4222_s26 = smov [#allocation13]   ;;  %s4158_s27 = scalar_lea.hbm %s4443_s6, 16 }
  0x68   :  { %s89_s5 = sshll.u32 %s4222_s26, 4  ;;  %p4159_p6 = scmp.ne.s32.totalorder %s4443_s6, %s4158_s27  ;;  %s90_s5 = int_to_ptr.vmem [resolvable:$true] %s89_s5 }
  0x69   :  { %p4162_p7 = scmp.lt.u32.totalorder %s4158_s27, %s4443_s6 }
  0x6b   :  { %p4164_p8 = pnand %p4162_p7, %p4159_p6 }
  0x6d   :  { %4167 = shalt.err (!%p4164_p8)
}
  0x6e   :  { %s4168_s11 = scalar_lea.vmem %s90_s5, 16  ;;  %s4172_s4 = scalar_lea.vmem %s90_s5, 32 }
  0x6f   :  { %p4169_p9 = scmp.ne.s32.totalorder %s90_s5, %s4168_s11  ;;  %p4173_p10 = scmp.lt.s32.totalorder %s90_s5, %s90_s5 }
  0x70   :  { %p4174_p11 = scmp.lt.s32.totalorder %s4172_s4, %s4168_s11 }
  0x72   :  { %p4175_p12 = por %p4174_p11, %p4173_p10 }
  0x74   :  { %p4176_p13 = pnand %p4175_p12, %p4169_p9 }
  0x76   :  { %4179 = shalt.err (!%p4176_p13)
}
  0x77   :  { %92 = dma.hbm_to_vmem [thread:$0]  %s4443_s6, 16, %s90_s5, [#allocation12]  }
  0x78   :  { %4202 = dma.done.wait [#allocation3], 896  }
  0x79   :  { %4203 = vsyncadd [#allocation3], 4294966400 }
  0x7a   :  { %4204 = dma.done.wait [#allocation6], 37728  }
  0x7b   :  { %4205 = vsyncadd [#allocation6], 4294929568 }
  0x7c   :  { %4206 = dma.done.wait [#allocation9], 5456  }
  0x7d   :  { %4207 = vsyncadd [#allocation9], 4294961840 }
  0x7e   :  { %4208 = dma.done.wait [#allocation12], 1040  }
  0x7f   :  { %4209 = vsyncadd [#allocation12], 4294966256  ;;  %v4223_v0 = vmov 0   ;;  %v3518_v1 = vld [vmem:[#allocation5 + $0x4] ss:$24 sps:$4 sm:$0xff]   ;;  %vm1925_vm0 = vcmask 130048  }
  0x80   :  { %2084 = vmatprep.mubr.bf16.mxu1 %v4223_v0  ;;  %v3520_v2 = vld [vmem:[#allocation5 + $0x904] ss:$24 sps:$4 sm:$0xff]   ;;  %1929 = vmatprep.subr.bf16.mxu0 %v3518_v1  ;;  %v3522_v3 = vld [vmem:[#allocation5] ss:$24 sps:$4 sm:$0xff]   ;;  %v3524_v5 = vld [vmem:[#allocation5 + $0x34] ss:$24 sps:$4 sm:$0xff]  }
  0x81   :  { %v3523_v4 = vld [vmem:[#allocation5 + $0x900] ss:$24 sps:$4 sm:$0xff]   ;;  %2052 = vmatprep.subr.bf16.mxu1 %v3520_v2  ;;  %1930 = vmatpush1.bf16.msra.mxu0 %v3522_v3  ;;  %v3528_v7 = vld [vmem:[#allocation5 + $0xc] ss:$24 sps:$4 sm:$0xff]   ;;  %v3529_v8 = vld [vmem:[#allocation5 + $0x30] ss:$24 sps:$4 sm:$0xff]  }
  0x82   :  { %2053 = vmatpush1.bf16.msra.mxu1 %v3523_v4  ;;  %v3526_v6 = vld [vmem:[#allocation5 + $0x8] ss:$24 sps:$4 sm:$0xff]   ;;  %1931 = vmatprep.subr.bf16.mxu0 %v3524_v5  ;;  %v121_v9 = vld [vmem:[#allocation2 + $0x30] sm:$0xff]  ;;  %v3536_v15 = vld [vmem:[#allocation5 + $0x94] ss:$24 sps:$4 sm:$0xff]   ;;  %vm2784_vm1 = vcmask 1041408  }
  0x83   :  { %2093 = vmatprep.subr.bf16.mxu1 %v3528_v7  ;;  %v4352_v10 = vpack.c.bf16 %v121_v9, %v121_v9  ;;  %v3530_v11 = vld [vmem:[#allocation5 + $0x64] ss:$24 sps:$4 sm:$0xff]   ;;  %v3532_v12 = vld [vmem:[#allocation5 + $0x38] ss:$24 sps:$4 sm:$0xff]   ;;  %v3538_v18 = vld [vmem:[#allocation5 + $0x68] ss:$24 sps:$4 sm:$0xff]  }
  0x84   :  { %v3534_v13 = vld [vmem:[#allocation5 + $0x3c] ss:$24 sps:$4 sm:$0xff]   ;;  %v3535_v14 = vld [vmem:[#allocation5 + $0x60] ss:$24 sps:$4 sm:$0xff]   ;;  %v3540_v16 = vld [vmem:[#allocation5 + $0x6c] ss:$24 sps:$4 sm:$0xff]  }
  0x85   :  { %1932 = vmatpush1.bf16.msra.mxu0 %v3529_v8  ;;  %3335 = vmatmul.mubr.msk.bf16.vlgmr.msra.gmra.mrb[0].mxu1 %vm1925_vm0, %v4352_v10  ;;  %v3541_v17 = vld [vmem:[#allocation5 + $0x90] ss:$24 sps:$4 sm:$0xff]   ;;  %v3542_v19 = vld [vmem:[#allocation5 + $0xc4] ss:$24 sps:$4 sm:$0xff]   ;;  %v3547_v22 = vld [vmem:[#allocation5 + $0xc0] ss:$24 sps:$4 sm:$0xff]  }
  0x86   :  { %2094 = vmatpush1.bf16.msra.mxu1 %v3526_v6  ;;  %1933 = vmatprep.subr.bf16.mxu0 %v3530_v11  ;;  %v3546_v20 = vld [vmem:[#allocation5 + $0x9c] ss:$24 sps:$4 sm:$0xff]   ;;  %v3544_v21 = vld [vmem:[#allocation5 + $0x98] ss:$24 sps:$4 sm:$0xff]   ;;  %v3552_v24 = vld [vmem:[#allocation5 + $0xcc] ss:$24 sps:$4 sm:$0xff]  }
  0x87   :  { %2095 = vmatprep.subr.bf16.mxu1 %v3534_v13  ;;  %v3548_v23 = vld [vmem:[#allocation5 + $0xf4] ss:$24 sps:$4 sm:$0xff]   ;;  %v3553_v25 = vld [vmem:[#allocation5 + $0xf0] ss:$24 sps:$4 sm:$0xff]   ;;  %v3554_v27 = vld [vmem:[#allocation5 + $0x124] ss:$24 sps:$4 sm:$0xff]  }
  0x88   :  { %v3550_v26 = vld [vmem:[#allocation5 + $0xc8] ss:$24 sps:$4 sm:$0xff]   ;;  %v3558_v28 = vld [vmem:[#allocation5 + $0xfc] ss:$24 sps:$4 sm:$0xff]   ;;  %v3556_v29 = vld [vmem:[#allocation5 + $0xf8] ss:$24 sps:$4 sm:$0xff]  }
  0x89   :  { %1934 = vmatpush1.bf16.msra.mxu0 %v3535_v14  ;;  %v3559_v30 = vld [vmem:[#allocation5 + $0x120] ss:$24 sps:$4 sm:$0xff]   ;;  %v3560_v31 = vld [vmem:[#allocation5 + $0x154] ss:$24 sps:$4 sm:$0xff]   ;;  %v3565_v33 = vld [vmem:[#allocation5 + $0x150] ss:$24 sps:$4 sm:$0xff]  }
  0x8a   :  { %2096 = vmatpush1.bf16.msra.mxu1 %v3532_v12  ;;  %1935 = vmatprep.subr.bf16.mxu0 %v3536_v15  ;;  %v3564_v32 = vld [vmem:[#allocation5 + $0x12c] ss:$24 sps:$4 sm:$0xff]   ;;  %v3562_v34 = vld [vmem:[#allocation5 + $0x128] ss:$24 sps:$4 sm:$0xff]   ;;  %v3570_v36 = vld [vmem:[#allocation5 + $0x15c] ss:$24 sps:$4 sm:$0xff]  }
  0x8b   :  { %2097 = vmatprep.subr.bf16.mxu1 %v3540_v16  ;;  %v3566_v35 = vld [vmem:[#allocation5 + $0x184] ss:$24 sps:$4 sm:$0xff]   ;;  %v3568_v37 = vld [vmem:[#allocation5 + $0x158] ss:$24 sps:$4 sm:$0xff]   ;;  %v3572_v39 = vld [vmem:[#allocation5 + $0x1b4] ss:$24 sps:$4 sm:$0xff]  }
  0x8c   :  { %v3571_v38 = vld [vmem:[#allocation5 + $0x180] ss:$24 sps:$4 sm:$0xff]   ;;  %v3576_v40 = vld [vmem:[#allocation5 + $0x18c] ss:$24 sps:$4 sm:$0xff]   ;;  %v3577_v41 = vld [vmem:[#allocation5 + $0x1b0] ss:$24 sps:$4 sm:$0xff]  }
  0x8d   :  { %1936 = vmatpush1.bf16.msra.mxu0 %v3541_v17  ;;  %v3574_v42 = vld [vmem:[#allocation5 + $0x188] ss:$24 sps:$4 sm:$0xff]   ;;  %v3578_v43 = vld [vmem:[#allocation5 + $0x1e4] ss:$24 sps:$4 sm:$0xff]   ;;  %v3580_v45 = vld [vmem:[#allocation5 + $0x1b8] ss:$24 sps:$4 sm:$0xff]  }
  0x8e   :  { %2098 = vmatpush1.bf16.msra.mxu1 %v3538_v18  ;;  %1937 = vmatprep.subr.bf16.mxu0 %v3542_v19  ;;  %v3582_v44 = vld [vmem:[#allocation5 + $0x1bc] ss:$24 sps:$4 sm:$0xff]   ;;  %v3583_v46 = vld [vmem:[#allocation5 + $0x1e0] ss:$24 sps:$4 sm:$0xff]   ;;  %v3588_v48 = vld [vmem:[#allocation5 + $0x1ec] ss:$24 sps:$4 sm:$0xff]  }
  0x8f   :  { %2099 = vmatprep.subr.bf16.mxu1 %v3546_v20  ;;  %v3584_v47 = vld [vmem:[#allocation5 + $0x214] ss:$24 sps:$4 sm:$0xff]   ;;  %v3589_v50 = vld [vmem:[#allocation5 + $0x210] ss:$24 sps:$4 sm:$0xff]   ;;  %v3590_v53 = vld [vmem:[#allocation5 + $0x244] ss:$24 sps:$4 sm:$0xff]  }
  0x90   :  { %v116_v49 = vld [vmem:[#allocation2 + $0x8] sm:$0xff]  ;;  %v3586_v52 = vld [vmem:[#allocation5 + $0x1e8] ss:$24 sps:$4 sm:$0xff]   ;;  %v3600_v58 = vld [vmem:[#allocation5 + $0x24c] ss:$24 sps:$4 sm:$0xff]   ;;  %vm2780_vm2 = vcmask 293888  }
  0x91   :  { %1938 = vmatpush1.bf16.msra.mxu0 %v3547_v22  ;;  %v4356_v51 = vpack.c.bf16 %v116_v49, %v116_v49  ;;  %v3594_v54 = vld [vmem:[#allocation5 + $0x21c] ss:$24 sps:$4 sm:$0xff]   ;;  %v3592_v55 = vld [vmem:[#allocation5 + $0x218] ss:$24 sps:$4 sm:$0xff]   ;;  %v3598_v59 = vld [vmem:[#allocation5 + $0x248] ss:$24 sps:$4 sm:$0xff]  }
  0x92   :  { %2100 = vmatpush1.bf16.msra.mxu1 %v3544_v21  ;;  %1939 = vmatprep.subr.bf16.mxu0 %v3548_v23  ;;  %v3595_v56 = vld [vmem:[#allocation5 + $0x240] ss:$24 sps:$4 sm:$0xff]   ;;  %v3596_v57 = vld [vmem:[#allocation5 + $0x274] ss:$24 sps:$4 sm:$0xff]   ;;  %v3601_v60 = vld [vmem:[#allocation5 + $0x270] ss:$24 sps:$4 sm:$0xff]  }
  0x93   :  { %2101 = vmatprep.subr.bf16.mxu1 %v3552_v24  ;;  %1961 = vmatprep.mubr.bf16.mxu0 %v4356_v51  ;;  %v3602_v61 = vld [vmem:[#allocation5 + $0x2a4] ss:$24 sps:$4 sm:$0xff]   ;;  %v3604_v63 = vld [vmem:[#allocation5 + $0x278] ss:$24 sps:$4 sm:$0xff]   ;;  %v3608_v2 = vld [vmem:[#allocation5 + $0x2d4] ss:$24 sps:$4 sm:$0xff]  }
  0x94   :  { %2125 = vmatprep.mubr.bf16.mxu1 %v4356_v51  ;;  %v3606_v62 = vld [vmem:[#allocation5 + $0x27c] ss:$24 sps:$4 sm:$0xff]   ;;  %v3607_v1 = vld [vmem:[#allocation5 + $0x2a0] ss:$24 sps:$4 sm:$0xff]   ;;  %v3612_v3 = vld [vmem:[#allocation5 + $0x2ac] ss:$24 sps:$4 sm:$0xff]  }
  0x95   :  { %1940 = vmatpush1.bf16.msra.mxu0 %v3553_v25  ;;  %v3610_v4 = vld [vmem:[#allocation5 + $0x2a8] ss:$24 sps:$4 sm:$0xff]   ;;  %v3616_v7 = vld [vmem:[#allocation5 + $0x304] ss:$24 sps:$4 sm:$0xff]   ;;  %v3617_v12 = vld [vmem:[#allocation5 + $0x2d8] ss:$24 sps:$4 sm:$0xff]  }
  0x96   :  { %2102 = vmatpush1.bf16.msra.mxu1 %v3550_v26  ;;  %1941 = vmatprep.subr.bf16.mxu0 %v3554_v27  ;;  %v3613_v5 = vld [vmem:[#allocation5 + $0x2d0] ss:$24 sps:$4 sm:$0xff]   ;;  %v3619_v8 = vld [vmem:[#allocation5 + $0x2dc] ss:$24 sps:$4 sm:$0xff]   ;;  %v3614_v11 = vld [vmem:[#allocation5 + $0x300] ss:$24 sps:$4 sm:$0xff]  }
  0x97   :  { %2103 = vmatprep.subr.bf16.mxu1 %v3558_v28  ;;  %v115_v6 = vld [vmem:[#allocation2] sm:$0xff]  ;;  %v3628_v17 = vld [vmem:[#allocation5 + $0x364] ss:$24 sps:$4 sm:$0xff]   ;;  %v3626_v19 = vld [vmem:[#allocation5 + $0x360] ss:$24 sps:$4 sm:$0xff]   ;;  %vm4225_vm3 = vmmov 0  }
  0x98   :  { %v4360_v9 = vpack.c.bf16 %v115_v6, %v115_v6  ;;  %v3622_v13 = vld [vmem:[#allocation5 + $0x334] ss:$24 sps:$4 sm:$0xff]   ;;  %v3620_v15 = vld [vmem:[#allocation5 + $0x330] ss:$24 sps:$4 sm:$0xff]   ;;  %v3640_v25 = vld [vmem:[#allocation5 + $0x3c4] ss:$24 sps:$4 sm:$0xff]  }
  0x99   :  { %1942 = vmatpush1.bf16.msra.mxu0 %v3559_v30  ;;  %v3625_v14 = vld [vmem:[#allocation5 + $0x30c] ss:$24 sps:$4 sm:$0xff]   ;;  %v3623_v16 = vld [vmem:[#allocation5 + $0x308] ss:$24 sps:$4 sm:$0xff]   ;;  %v3631_v18 = vld [vmem:[#allocation5 + $0x33c] ss:$24 sps:$4 sm:$0xff]  }
  0x9a   :  { %2104 = vmatpush1.bf16.msra.mxu1 %v3556_v29  ;;  %1943 = vmatprep.subr.bf16.mxu0 %v3560_v31  ;;  %v3629_v20 = vld [vmem:[#allocation5 + $0x338] ss:$24 sps:$4 sm:$0xff]   ;;  %v3634_v21 = vld [vmem:[#allocation5 + $0x394] ss:$24 sps:$4 sm:$0xff]   ;;  %v3635_v24 = vld [vmem:[#allocation5 + $0x368] ss:$24 sps:$4 sm:$0xff]  }
  0x9b   :  { %2105 = vmatprep.subr.bf16.mxu1 %v3564_v32  ;;  %v3637_v22 = vld [vmem:[#allocation5 + $0x36c] ss:$24 sps:$4 sm:$0xff]   ;;  %v3632_v23 = vld [vmem:[#allocation5 + $0x390] ss:$24 sps:$4 sm:$0xff]   ;;  %v3643_v26 = vld [vmem:[#allocation5 + $0x39c] ss:$24 sps:$4 sm:$0xff]  }
  0x9c   :  { %v3638_v27 = vld [vmem:[#allocation5 + $0x3c0] ss:$24 sps:$4 sm:$0xff]   ;;  %v3646_v29 = vld [vmem:[#allocation5 + $0x3f4] ss:$24 sps:$4 sm:$0xff]   ;;  %v3644_v31 = vld [vmem:[#allocation5 + $0x3f0] ss:$24 sps:$4 sm:$0xff]  }
  0x9d   :  { %1944 = vmatpush1.bf16.msra.mxu0 %v3565_v33  ;;  %v3641_v28 = vld [vmem:[#allocation5 + $0x398] ss:$24 sps:$4 sm:$0xff]   ;;  %v3649_v30 = vld [vmem:[#allocation5 + $0x3cc] ss:$24 sps:$4 sm:$0xff]   ;;  %v3647_v32 = vld [vmem:[#allocation5 + $0x3c8] ss:$24 sps:$4 sm:$0xff]  }
  0x9e   :  { %2106 = vmatpush1.bf16.msra.mxu1 %v3562_v34  ;;  %1945 = vmatprep.subr.bf16.mxu0 %v3566_v35  ;;  %v3652_v33 = vld [vmem:[#allocation5 + $0x424] ss:$24 sps:$4 sm:$0xff]   ;;  %v3668_v49 = vld [vmem:[#allocation5 + $0x4b0] ss:$24 sps:$4 sm:$0xff]   ;;  %s4226_s6 = smov [#allocation14]  }
  0x9f   :  { %2107 = vmatprep.subr.bf16.mxu1 %v3570_v36  ;;  %v3655_v34 = vld [vmem:[#allocation5 + $0x3fc] ss:$24 sps:$4 sm:$0xff]   ;;  %v118_v35 = vld [vmem:[#allocation2 + $0x18] sm:$0xff]  ;;  %s3029_s13 = sshll.u32 %s4226_s6, 4  ;;  %s3030_s13 = int_to_ptr.vmem [resolvable:$true] %s3029_s13 }
  0xa0   :  { %v4364_v36 = vpack.c.bf16 %v118_v35, %v118_v35  ;;  %v3703_v6 = vld [vmem:[#allocation5 + $0x57c] ss:$24 sps:$4 sm:$0xff]   ;;  %s4180_s14 = scalar_lea.vmem %s3030_s13, 128  ;;  %p4185_p1 = scmp.lt.s32.totalorder %s3030_s13, %s3030_s13 }
  0xa1   :  { %1946 = vmatpush1.bf16.msra.mxu0 %v3571_v38  ;;  %v3653_v38 = vld [vmem:[#allocation5 + $0x3f8] ss:$24 sps:$4 sm:$0xff]   ;;  %v3736_v35 = vld [vmem:[#allocation5 + $0x6c4] ss:$24 sps:$4 sm:$0xff]   ;;  %p4181_p0 = scmp.ne.s32.totalorder %s3030_s13, %s4180_s14  ;;  %p4186_p2 = scmp.lt.s32.totalorder %s4180_s14, %s4180_s14 }
  0xa2   :  { %2108 = vmatpush1.bf16.msra.mxu1 %v3568_v37  ;;  %1947 = vmatprep.subr.bf16.mxu0 %v3572_v39  ;;  %v3650_v37 = vld [vmem:[#allocation5 + $0x420] ss:$24 sps:$4 sm:$0xff]   ;;  %v3658_v39 = vld [vmem:[#allocation5 + $0x454] ss:$24 sps:$4 sm:$0xff]  }
  0xa3   :  { %2109 = vmatprep.subr.bf16.mxu1 %v3576_v40  ;;  %v3661_v40 = vld [vmem:[#allocation5 + $0x42c] ss:$24 sps:$4 sm:$0xff]   ;;  %p4187_p3 = por %p4186_p2, %p4185_p1 }
  0xa5   :  { %1948 = vmatpush1.bf16.msra.mxu0 %v3577_v41  ;;  %v3656_v41 = vld [vmem:[#allocation5 + $0x450] ss:$24 sps:$4 sm:$0xff]   ;;  %p4188_p4 = pnand %p4187_p3, %p4181_p0 }
  0xa6   :  { %2110 = vmatpush1.bf16.msra.mxu1 %v3574_v42  ;;  %1949 = vmatprep.subr.bf16.mxu0 %v3578_v43  ;;  %v3659_v42 = vld [vmem:[#allocation5 + $0x428] ss:$24 sps:$4 sm:$0xff]   ;;  %v3664_v43 = vld [vmem:[#allocation5 + $0x484] ss:$24 sps:$4 sm:$0xff]  }
  0xa7   :  { %2111 = vmatprep.subr.bf16.mxu1 %v3582_v44  ;;  %v3667_v44 = vld [vmem:[#allocation5 + $0x45c] ss:$24 sps:$4 sm:$0xff]  }
  0xa9   :  { %1950 = vmatpush1.bf16.msra.mxu0 %v3583_v46  ;;  %v3665_v46 = vld [vmem:[#allocation5 + $0x458] ss:$24 sps:$4 sm:$0xff]  }
  0xaa   :  { %2112 = vmatpush1.bf16.msra.mxu1 %v3580_v45  ;;  %1951 = vmatprep.subr.bf16.mxu0 %v3584_v47  ;;  %v3662_v45 = vld [vmem:[#allocation5 + $0x480] ss:$24 sps:$4 sm:$0xff]   ;;  %v3670_v47 = vld [vmem:[#allocation5 + $0x4b4] ss:$24 sps:$4 sm:$0xff]  }
  0xab   :  { %2113 = vmatprep.subr.bf16.mxu1 %v3588_v48  ;;  %v3673_v48 = vld [vmem:[#allocation5 + $0x48c] ss:$24 sps:$4 sm:$0xff]  }
  0xad   :  { %1952 = vmatpush1.bf16.msra.mxu0 %v3589_v50  ;;  %v3671_v50 = vld [vmem:[#allocation5 + $0x488] ss:$24 sps:$4 sm:$0xff]  }
  0xae   :  { %2114 = vmatpush1.bf16.msra.mxu1 %v3586_v52  ;;  %1953 = vmatprep.subr.bf16.mxu0 %v3590_v53  ;;  %v3676_v52 = vld [vmem:[#allocation5 + $0x4e4] ss:$24 sps:$4 sm:$0xff]  }
  0xaf   :  { %2115 = vmatprep.subr.bf16.mxu1 %v3594_v54  ;;  %v3679_v53 = vld [vmem:[#allocation5 + $0x4bc] ss:$24 sps:$4 sm:$0xff]   ;;  %v3674_v54 = vld [vmem:[#allocation5 + $0x4e0] ss:$24 sps:$4 sm:$0xff]  }
  0xb1   :  { %1954 = vmatpush1.bf16.msra.mxu0 %v3595_v56  ;;  %v3682_v56 = vld [vmem:[#allocation5 + $0x514] ss:$24 sps:$4 sm:$0xff]  }
  0xb2   :  { %2116 = vmatpush1.bf16.msra.mxu1 %v3592_v55  ;;  %1955 = vmatprep.subr.bf16.mxu0 %v3596_v57  ;;  %v3677_v55 = vld [vmem:[#allocation5 + $0x4b8] ss:$24 sps:$4 sm:$0xff]   ;;  %v3685_v57 = vld [vmem:[#allocation5 + $0x4ec] ss:$24 sps:$4 sm:$0xff]  }
  0xb3   :  { %2117 = vmatprep.subr.bf16.mxu1 %v3600_v58  ;;  %v3680_v58 = vld [vmem:[#allocation5 + $0x510] ss:$24 sps:$4 sm:$0xff]  }
  0xb5   :  { %1956 = vmatpush1.bf16.msra.mxu0 %v3601_v60  ;;  %v3688_v60 = vld [vmem:[#allocation5 + $0x544] ss:$24 sps:$4 sm:$0xff]  }
  0xb6   :  { %2118 = vmatpush1.bf16.msra.mxu1 %v3598_v59  ;;  %1957 = vmatprep.subr.bf16.mxu0 %v3602_v61  ;;  %v3683_v59 = vld [vmem:[#allocation5 + $0x4e8] ss:$24 sps:$4 sm:$0xff]   ;;  %v3691_v61 = vld [vmem:[#allocation5 + $0x51c] ss:$24 sps:$4 sm:$0xff]  }
  0xb7   :  { %2119 = vmatprep.subr.bf16.mxu1 %v3606_v62  ;;  %v3686_v62 = vld [vmem:[#allocation5 + $0x540] ss:$24 sps:$4 sm:$0xff]  }
  0xb9   :  { %1958 = vmatpush1.bf16.msra.mxu0 %v3607_v1  ;;  %v3694_v1 = vld [vmem:[#allocation5 + $0x574] ss:$24 sps:$4 sm:$0xff]  }
  0xba   :  { %2120 = vmatpush1.bf16.msra.mxu1 %v3604_v63  ;;  %1959 = vmatprep.subr.bf16.mxu0 %v3608_v2  ;;  %v3689_v63 = vld [vmem:[#allocation5 + $0x518] ss:$24 sps:$4 sm:$0xff]   ;;  %v3697_v2 = vld [vmem:[#allocation5 + $0x54c] ss:$24 sps:$4 sm:$0xff]  }
  0xbb   :  { %2121 = vmatprep.subr.bf16.mxu1 %v3612_v3  ;;  %v3692_v3 = vld [vmem:[#allocation5 + $0x570] ss:$24 sps:$4 sm:$0xff]  }
  0xbd   :  { %1960 = vmatpush1.bf16.msra.mxu0 %v3613_v5  ;;  %v3700_v5 = vld [vmem:[#allocation5 + $0x5a4] ss:$24 sps:$4 sm:$0xff]  }
  0xbe   :  { %2122 = vmatpush1.bf16.msra.mxu1 %v3610_v4  ;;  %1970 = vmatprep.subr.bf16.mxu0 %v3616_v7  ;;  %v3695_v4 = vld [vmem:[#allocation5 + $0x548] ss:$24 sps:$4 sm:$0xff]  }
  0xbf   :  { %2123 = vmatprep.subr.bf16.mxu1 %v3619_v8  ;;  %v3698_v7 = vld [vmem:[#allocation5 + $0x5a0] ss:$24 sps:$4 sm:$0xff]  }
  0xc0   :  { %1962 = vmatmul.mubr.bf16.vlgmr.msra.gmra.mrb[0].mxu0 %v4360_v9  ;;  %v3701_v8 = vld [vmem:[#allocation5 + $0x578] ss:$24 sps:$4 sm:$0xff]  }
  0xc1   :  { %1971 = vmatpush1.bf16.msra.mxu0 %v3614_v11  ;;  %2002 = vmatprep.mubr.bf16.mxu0 %v4364_v36  ;;  %v3706_v11 = vld [vmem:[#allocation5 + $0x5d4] ss:$24 sps:$4 sm:$0xff]  }
  0xc2   :  { %2124 = vmatpush1.bf16.msra.mxu1 %v3617_v12  ;;  %1972 = vmatprep.subr.bf16.mxu0 %v3622_v13  ;;  %v3709_v12 = vld [vmem:[#allocation5 + $0x5ac] ss:$24 sps:$4 sm:$0xff]   ;;  %v3704_v13 = vld [vmem:[#allocation5 + $0x5d0] ss:$24 sps:$4 sm:$0xff]  }
  0xc3   :  { %2134 = vmatprep.subr.bf16.mxu1 %v3625_v14  ;;  %v117_v14 = vld [vmem:[#allocation2 + $0x10] sm:$0xff] }
  0xc5   :  { %1973 = vmatpush1.bf16.msra.mxu0 %v3620_v15  ;;  %2126 = vmatmul.mubr.bf16.vlgmr.msra.gmra.mrb[4].mxu1 %v4360_v9  ;;  %v3707_v15 = vld [vmem:[#allocation5 + $0x5a8] ss:$24 sps:$4 sm:$0xff]  }
  0xc6   :  { %2135 = vmatpush1.bf16.msra.mxu1 %v3623_v16  ;;  %1974 = vmatprep.subr.bf16.mxu0 %v3628_v17  ;;  %v3712_v16 = vld [vmem:[#allocation5 + $0x604] ss:$24 sps:$4 sm:$0xff]  }
  0xc7   :  { %2136 = vmatprep.subr.bf16.mxu1 %v3631_v18  ;;  %2166 = vmatprep.mubr.bf16.mxu1 %v4364_v36  ;;  %v3715_v17 = vld [vmem:[#allocation5 + $0x5dc] ss:$24 sps:$4 sm:$0xff]   ;;  %v4368_v18 = vpack.c.bf16 %v117_v14, %v117_v14  ;;  %v3788_v14 = vld [vmem:[#allocation5 + $0x870] ss:$24 sps:$4 sm:$0xff]  }
  0xc9   :  { %1975 = vmatpush1.bf16.msra.mxu0 %v3626_v19  ;;  %v3710_v19 = vld [vmem:[#allocation5 + $0x600] ss:$24 sps:$4 sm:$0xff]  }
  0xca   :  { %2137 = vmatpush1.bf16.msra.mxu1 %v3629_v20  ;;  %1976 = vmatprep.subr.bf16.mxu0 %v3634_v21  ;;  %v3713_v20 = vld [vmem:[#allocation5 + $0x5d8] ss:$24 sps:$4 sm:$0xff]   ;;  %v3718_v21 = vld [vmem:[#allocation5 + $0x634] ss:$24 sps:$4 sm:$0xff]  }
  0xcb   :  { %2138 = vmatprep.subr.bf16.mxu1 %v3637_v22  ;;  %v120_v22 = vld [vmem:[#allocation2 + $0x28] sm:$0xff] }
  0xcd   :  { %1977 = vmatpush1.bf16.msra.mxu0 %v3632_v23  ;;  %v3721_v23 = vld [vmem:[#allocation5 + $0x60c] ss:$24 sps:$4 sm:$0xff]  }
  0xce   :  { %2139 = vmatpush1.bf16.msra.mxu1 %v3635_v24  ;;  %1978 = vmatprep.subr.bf16.mxu0 %v3640_v25  ;;  %v4370_v24 = vpack.c.bf16 %v120_v22, %v120_v22  ;;  %v3716_v25 = vld [vmem:[#allocation5 + $0x630] ss:$24 sps:$4 sm:$0xff]   ;;  %v3805_v22 = vld [vmem:[#allocation5 + $0x8ac] ss:$24 sps:$4 sm:$0xff]  }
  0xcf   :  { %2140 = vmatprep.subr.bf16.mxu1 %v3643_v26  ;;  %v3719_v26 = vld [vmem:[#allocation5 + $0x608] ss:$24 sps:$4 sm:$0xff]  }
  0xd1   :  { %1979 = vmatpush1.bf16.msra.mxu0 %v3638_v27  ;;  %v3724_v27 = vld [vmem:[#allocation5 + $0x664] ss:$24 sps:$4 sm:$0xff]  }
  0xd2   :  { %2141 = vmatpush1.bf16.msra.mxu1 %v3641_v28  ;;  %1980 = vmatprep.subr.bf16.mxu0 %v3646_v29  ;;  %v3727_v28 = vld [vmem:[#allocation5 + $0x63c] ss:$24 sps:$4 sm:$0xff]   ;;  %v3722_v29 = vld [vmem:[#allocation5 + $0x660] ss:$24 sps:$4 sm:$0xff]  }
  0xd3   :  { %2142 = vmatprep.subr.bf16.mxu1 %v3649_v30  ;;  %v3725_v30 = vld [vmem:[#allocation5 + $0x638] ss:$24 sps:$4 sm:$0xff]  }
  0xd5   :  { %1981 = vmatpush1.bf16.msra.mxu0 %v3644_v31  ;;  %v3730_v31 = vld [vmem:[#allocation5 + $0x694] ss:$24 sps:$4 sm:$0xff]  }
  0xd6   :  { %2143 = vmatpush1.bf16.msra.mxu1 %v3647_v32  ;;  %1982 = vmatprep.subr.bf16.mxu0 %v3652_v33  ;;  %v3733_v32 = vld [vmem:[#allocation5 + $0x66c] ss:$24 sps:$4 sm:$0xff]   ;;  %v3728_v33 = vld [vmem:[#allocation5 + $0x690] ss:$24 sps:$4 sm:$0xff]  }
  0xd7   :  { %2144 = vmatprep.subr.bf16.mxu1 %v3655_v34  ;;  %v3731_v34 = vld [vmem:[#allocation5 + $0x668] ss:$24 sps:$4 sm:$0xff]  }
  0xd9   :  { %1983 = vmatpush1.bf16.msra.mxu0 %v3650_v37  ;;  %v3739_v37 = vld [vmem:[#allocation5 + $0x69c] ss:$24 sps:$4 sm:$0xff]  }
  0xda   :  { %2145 = vmatpush1.bf16.msra.mxu1 %v3653_v38  ;;  %1984 = vmatprep.subr.bf16.mxu0 %v3658_v39  ;;  %v3734_v38 = vld [vmem:[#allocation5 + $0x6c0] ss:$24 sps:$4 sm:$0xff]  }
  0xdb   :  { %2146 = vmatprep.subr.bf16.mxu1 %v3661_v40  ;;  %v3737_v39 = vld [vmem:[#allocation5 + $0x698] ss:$24 sps:$4 sm:$0xff]   ;;  %v3742_v40 = vld [vmem:[#allocation5 + $0x6f4] ss:$24 sps:$4 sm:$0xff]  }
  0xdd   :  { %1985 = vmatpush1.bf16.msra.mxu0 %v3656_v41  ;;  %v3745_v41 = vld [vmem:[#allocation5 + $0x6cc] ss:$24 sps:$4 sm:$0xff]  }
  0xde   :  { %2147 = vmatpush1.bf16.msra.mxu1 %v3659_v42  ;;  %1986 = vmatprep.subr.bf16.mxu0 %v3664_v43  ;;  %v3740_v42 = vld [vmem:[#allocation5 + $0x6f0] ss:$24 sps:$4 sm:$0xff]  }
  0xdf   :  { %2148 = vmatprep.subr.bf16.mxu1 %v3667_v44  ;;  %v3743_v43 = vld [vmem:[#allocation5 + $0x6c8] ss:$24 sps:$4 sm:$0xff]   ;;  %v3748_v44 = vld [vmem:[#allocation5 + $0x724] ss:$24 sps:$4 sm:$0xff]  }
  0xe1   :  { %1987 = vmatpush1.bf16.msra.mxu0 %v3662_v45  ;;  %v3751_v45 = vld [vmem:[#allocation5 + $0x6fc] ss:$24 sps:$4 sm:$0xff]  }
  0xe2   :  { %2149 = vmatpush1.bf16.msra.mxu1 %v3665_v46  ;;  %1988 = vmatprep.subr.bf16.mxu0 %v3670_v47  ;;  %v3746_v46 = vld [vmem:[#allocation5 + $0x720] ss:$24 sps:$4 sm:$0xff]  }
  0xe3   :  { %2150 = vmatprep.subr.bf16.mxu1 %v3673_v48  ;;  %v3749_v47 = vld [vmem:[#allocation5 + $0x6f8] ss:$24 sps:$4 sm:$0xff]   ;;  %v3754_v48 = vld [vmem:[#allocation5 + $0x754] ss:$24 sps:$4 sm:$0xff]  }
  0xe5   :  { %1989 = vmatpush1.bf16.msra.mxu0 %v3668_v49  ;;  %v3757_v49 = vld [vmem:[#allocation5 + $0x72c] ss:$24 sps:$4 sm:$0xff]  }
  0xe6   :  { %2151 = vmatpush1.bf16.msra.mxu1 %v3671_v50  ;;  %1990 = vmatprep.subr.bf16.mxu0 %v3676_v52  ;;  %v3752_v50 = vld [vmem:[#allocation5 + $0x750] ss:$24 sps:$4 sm:$0xff]  }
  0xe7   :  { %2152 = vmatprep.subr.bf16.mxu1 %v3679_v53  ;;  %v3755_v52 = vld [vmem:[#allocation5 + $0x728] ss:$24 sps:$4 sm:$0xff]   ;;  %v3760_v53 = vld [vmem:[#allocation5 + $0x784] ss:$24 sps:$4 sm:$0xff]  }
  0xe9   :  { %1991 = vmatpush1.bf16.msra.mxu0 %v3674_v54  ;;  %v3763_v54 = vld [vmem:[#allocation5 + $0x75c] ss:$24 sps:$4 sm:$0xff]  }
  0xea   :  { %2153 = vmatpush1.bf16.msra.mxu1 %v3677_v55  ;;  %1992 = vmatprep.subr.bf16.mxu0 %v3682_v56  ;;  %v3758_v55 = vld [vmem:[#allocation5 + $0x780] ss:$24 sps:$4 sm:$0xff]  }
  0xeb   :  { %2154 = vmatprep.subr.bf16.mxu1 %v3685_v57  ;;  %v3761_v56 = vld [vmem:[#allocation5 + $0x758] ss:$24 sps:$4 sm:$0xff]   ;;  %v3766_v57 = vld [vmem:[#allocation5 + $0x7b4] ss:$24 sps:$4 sm:$0xff]  }
  0xed   :  { %1993 = vmatpush1.bf16.msra.mxu0 %v3680_v58  ;;  %v3769_v58 = vld [vmem:[#allocation5 + $0x78c] ss:$24 sps:$4 sm:$0xff]  }
  0xee   :  { %2155 = vmatpush1.bf16.msra.mxu1 %v3683_v59  ;;  %1994 = vmatprep.subr.bf16.mxu0 %v3688_v60  ;;  %v3764_v59 = vld [vmem:[#allocation5 + $0x7b0] ss:$24 sps:$4 sm:$0xff]  }
  0xef   :  { %2156 = vmatprep.subr.bf16.mxu1 %v3691_v61  ;;  %v3767_v60 = vld [vmem:[#allocation5 + $0x788] ss:$24 sps:$4 sm:$0xff]   ;;  %v3772_v61 = vld [vmem:[#allocation5 + $0x7e4] ss:$24 sps:$4 sm:$0xff]  }
  0xf1   :  { %1995 = vmatpush1.bf16.msra.mxu0 %v3686_v62  ;;  %v3775_v62 = vld [vmem:[#allocation5 + $0x7bc] ss:$24 sps:$4 sm:$0xff]  }
  0xf2   :  { %2157 = vmatpush1.bf16.msra.mxu1 %v3689_v63  ;;  %1996 = vmatprep.subr.bf16.mxu0 %v3694_v1  ;;  %v3770_v63 = vld [vmem:[#allocation5 + $0x7e0] ss:$24 sps:$4 sm:$0xff]  }
  0xf3   :  { %2158 = vmatprep.subr.bf16.mxu1 %v3697_v2  ;;  %v3773_v1 = vld [vmem:[#allocation5 + $0x7b8] ss:$24 sps:$4 sm:$0xff]   ;;  %v3778_v2 = vld [vmem:[#allocation5 + $0x814] ss:$24 sps:$4 sm:$0xff]  }
  0xf5   :  { %1997 = vmatpush1.bf16.msra.mxu0 %v3692_v3  ;;  %v3781_v3 = vld [vmem:[#allocation5 + $0x7ec] ss:$24 sps:$4 sm:$0xff]  }
  0xf6   :  { %2159 = vmatpush1.bf16.msra.mxu1 %v3695_v4  ;;  %1998 = vmatprep.subr.bf16.mxu0 %v3700_v5  ;;  %v3776_v4 = vld [vmem:[#allocation5 + $0x810] ss:$24 sps:$4 sm:$0xff]  }
  0xf7   :  { %2160 = vmatprep.subr.bf16.mxu1 %v3703_v6  ;;  %v3779_v5 = vld [vmem:[#allocation5 + $0x7e8] ss:$24 sps:$4 sm:$0xff]   ;;  %v3784_v6 = vld [vmem:[#allocation5 + $0x844] ss:$24 sps:$4 sm:$0xff]  }
  0xf9   :  { %1999 = vmatpush1.bf16.msra.mxu0 %v3698_v7  ;;  %v3787_v7 = vld [vmem:[#allocation5 + $0x81c] ss:$24 sps:$4 sm:$0xff]  }
  0xfa   :  { %2161 = vmatpush1.bf16.msra.mxu1 %v3701_v8  ;;  %2000 = vmatprep.subr.bf16.mxu0 %v3706_v11  ;;  %v3782_v8 = vld [vmem:[#allocation5 + $0x840] ss:$24 sps:$4 sm:$0xff]  }
  0xfb   :  { %2162 = vmatprep.subr.bf16.mxu1 %v3709_v12  ;;  %v3785_v11 = vld [vmem:[#allocation5 + $0x818] ss:$24 sps:$4 sm:$0xff]   ;;  %v3790_v12 = vld [vmem:[#allocation5 + $0x874] ss:$24 sps:$4 sm:$0xff]  }
  0xfd   :  { %2001 = vmatpush1.bf16.msra.mxu0 %v3704_v13  ;;  %v3793_v13 = vld [vmem:[#allocation5 + $0x84c] ss:$24 sps:$4 sm:$0xff]  }
  0xfe   :  { %2163 = vmatpush1.bf16.msra.mxu1 %v3707_v15  ;;  %2011 = vmatprep.subr.bf16.mxu0 %v3712_v16  ;;  %v3791_v15 = vld [vmem:[#allocation5 + $0x848] ss:$24 sps:$4 sm:$0xff]   ;;  %v3796_v16 = vld [vmem:[#allocation5 + $0x8a4] ss:$24 sps:$4 sm:$0xff]  }
  0xff   :  { %2164 = vmatprep.subr.bf16.mxu1 %v3715_v17  ;;  %v3799_v17 = vld [vmem:[#allocation5 + $0x87c] ss:$24 sps:$4 sm:$0xff]  }
 0x100   :  { %2003 = vmatmul.mubr.bf16.vlgmr.msra.gmra.mrb[0].mxu0 %v4368_v18 }
 0x101   :  { %2012 = vmatpush1.bf16.msra.mxu0 %v3710_v19  ;;  %2043 = vmatprep.mubr.bf16.mxu0 %v4370_v24  ;;  %v3794_v19 = vld [vmem:[#allocation5 + $0x8a0] ss:$24 sps:$4 sm:$0xff]  }
 0x102   :  { %2165 = vmatpush1.bf16.msra.mxu1 %v3713_v20  ;;  %2013 = vmatprep.subr.bf16.mxu0 %v3718_v21  ;;  %v3797_v20 = vld [vmem:[#allocation5 + $0x878] ss:$24 sps:$4 sm:$0xff]   ;;  %v3802_v21 = vld [vmem:[#allocation5 + $0x8d4] ss:$24 sps:$4 sm:$0xff]  }
 0x103   :  { %2175 = vmatprep.subr.bf16.mxu1 %v3721_v23  ;;  %v3800_v23 = vld [vmem:[#allocation5 + $0x8d0] ss:$24 sps:$4 sm:$0xff]  }
 0x105   :  { %2014 = vmatpush1.bf16.msra.mxu0 %v3716_v25  ;;  %2167 = vmatmul.mubr.bf16.vlgmr.msra.gmra.mrb[4].mxu1 %v4368_v18  ;;  %v119_v25 = vld [vmem:[#allocation2 + $0x20] sm:$0xff] }
 0x106   :  { %2176 = vmatpush1.bf16.msra.mxu1 %v3719_v26  ;;  %2015 = vmatprep.subr.bf16.mxu0 %v3724_v27  ;;  %v3803_v26 = vld [vmem:[#allocation5 + $0x8a8] ss:$24 sps:$4 sm:$0xff]   ;;  %v3808_v27 = vld [vmem:[#allocation5 + $0x8dc] ss:$24 sps:$4 sm:$0xff]  }
 0x107   :  { %2177 = vmatprep.subr.bf16.mxu1 %v3727_v28  ;;  %2207 = vmatprep.mubr.bf16.mxu1 %v4370_v24  ;;  %v3811_v28 = vld [vmem:[#allocation5 + $0x14] ss:$24 sps:$4 sm:$0xff]  }
 0x109   :  { %2016 = vmatpush1.bf16.msra.mxu0 %v3722_v29  ;;  %v3809_v29 = vld [vmem:[#allocation5 + $0x10] ss:$24 sps:$4 sm:$0xff]  }
 0x10a   :  { %2178 = vmatpush1.bf16.msra.mxu1 %v3725_v30  ;;  %2017 = vmatprep.subr.bf16.mxu0 %v3730_v31  ;;  %v4376_v30 = vpack.c.bf16 %v119_v25, %v119_v25  ;;  %v3806_v31 = vld [vmem:[#allocation5 + $0x8d8] ss:$24 sps:$4 sm:$0xff]   ;;  %v3874_v25 = vld [vmem:[#allocation5 + $0x3d4] ss:$24 sps:$4 sm:$0xff]  }
 0x10b   :  { %2179 = vmatprep.subr.bf16.mxu1 %v3733_v32  ;;  %v3814_v32 = vld [vmem:[#allocation5 + $0x44] ss:$24 sps:$4 sm:$0xff]  }
 0x10d   :  { %2018 = vmatpush1.bf16.msra.mxu0 %v3728_v33  ;;  %v3820_v33 = vld [vmem:[#allocation5 + $0x90c] ss:$24 sps:$4 sm:$0xff]  }
 0x10e   :  { %2180 = vmatpush1.bf16.msra.mxu1 %v3731_v34  ;;  %2019 = vmatprep.subr.bf16.mxu0 %v3736_v35  ;;  %v3812_v34 = vld [vmem:[#allocation5 + $0x40] ss:$24 sps:$4 sm:$0xff]   ;;  %v3817_v35 = vld [vmem:[#allocation5 + $0x74] ss:$24 sps:$4 sm:$0xff]  }
 0x10f   :  { %2181 = vmatprep.subr.bf16.mxu1 %v3739_v37  ;;  %v3818_v37 = vld [vmem:[#allocation5 + $0x908] ss:$24 sps:$4 sm:$0xff]  }
 0x111   :  { %2020 = vmatpush1.bf16.msra.mxu0 %v3734_v38  ;;  %v3815_v38 = vld [vmem:[#allocation5 + $0x70] ss:$24 sps:$4 sm:$0xff]  }
 0x112   :  { %2182 = vmatpush1.bf16.msra.mxu1 %v3737_v39  ;;  %2021 = vmatprep.subr.bf16.mxu0 %v3742_v40  ;;  %v3823_v39 = vld [vmem:[#allocation5 + $0xa4] ss:$24 sps:$4 sm:$0xff]   ;;  %v3821_v40 = vld [vmem:[#allocation5 + $0xa0] ss:$24 sps:$4 sm:$0xff]  }
 0x113   :  { %2183 = vmatprep.subr.bf16.mxu1 %v3745_v41  ;;  %v3826_v41 = vld [vmem:[#allocation5 + $0xd4] ss:$24 sps:$4 sm:$0xff]  }
 0x115   :  { %2022 = vmatpush1.bf16.msra.mxu0 %v3740_v42  ;;  %v3824_v42 = vld [vmem:[#allocation5 + $0xd0] ss:$24 sps:$4 sm:$0xff]  }
 0x116   :  { %2184 = vmatpush1.bf16.msra.mxu1 %v3743_v43  ;;  %2023 = vmatprep.subr.bf16.mxu0 %v3748_v44  ;;  %v3829_v43 = vld [vmem:[#allocation5 + $0x104] ss:$24 sps:$4 sm:$0xff]   ;;  %v3832_v44 = vld [vmem:[#allocation5 + $0x134] ss:$24 sps:$4 sm:$0xff]  }
 0x117   :  { %2185 = vmatprep.subr.bf16.mxu1 %v3751_v45  ;;  %v3830_v45 = vld [vmem:[#allocation5 + $0x130] ss:$24 sps:$4 sm:$0xff]  }
 0x119   :  { %2024 = vmatpush1.bf16.msra.mxu0 %v3746_v46  ;;  %v3835_v46 = vld [vmem:[#allocation5 + $0x164] ss:$24 sps:$4 sm:$0xff]  }
 0x11a   :  { %2186 = vmatpush1.bf16.msra.mxu1 %v3749_v47  ;;  %2025 = vmatprep.subr.bf16.mxu0 %v3754_v48  ;;  %v3833_v47 = vld [vmem:[#allocation5 + $0x160] ss:$24 sps:$4 sm:$0xff]   ;;  %v3838_v48 = vld [vmem:[#allocation5 + $0x194] ss:$24 sps:$4 sm:$0xff]  }
 0x11b   :  { %2187 = vmatprep.subr.bf16.mxu1 %v3757_v49 }
 0x11d   :  { %2026 = vmatpush1.bf16.msra.mxu0 %v3752_v50 }
 0x11e   :  { %2188 = vmatpush1.bf16.msra.mxu1 %v3755_v52  ;;  %2027 = vmatprep.subr.bf16.mxu0 %v3760_v53 }
 0x11f   :  { %2189 = vmatprep.subr.bf16.mxu1 %v3763_v54  ;;  %v3836_v54 = vld [vmem:[#allocation5 + $0x190] ss:$24 sps:$4 sm:$0xff]  }
 0x121   :  { %2028 = vmatpush1.bf16.msra.mxu0 %v3758_v55  ;;  %v3841_v55 = vld [vmem:[#allocation5 + $0x1c4] ss:$24 sps:$4 sm:$0xff]  }
 0x122   :  { %2190 = vmatpush1.bf16.msra.mxu1 %v3761_v56  ;;  %2029 = vmatprep.subr.bf16.mxu0 %v3766_v57  ;;  %v3839_v56 = vld [vmem:[#allocation5 + $0x1c0] ss:$24 sps:$4 sm:$0xff]   ;;  %v3844_v57 = vld [vmem:[#allocation5 + $0x1f4] ss:$24 sps:$4 sm:$0xff]  }
 0x123   :  { %2191 = vmatprep.subr.bf16.mxu1 %v3769_v58  ;;  %v3842_v58 = vld [vmem:[#allocation5 + $0x1f0] ss:$24 sps:$4 sm:$0xff]  }
 0x125   :  { %2030 = vmatpush1.bf16.msra.mxu0 %v3764_v59  ;;  %v3847_v59 = vld [vmem:[#allocation5 + $0x224] ss:$24 sps:$4 sm:$0xff]  }
 0x126   :  { %2192 = vmatpush1.bf16.msra.mxu1 %v3767_v60  ;;  %2031 = vmatprep.subr.bf16.mxu0 %v3772_v61  ;;  %v3845_v60 = vld [vmem:[#allocation5 + $0x220] ss:$24 sps:$4 sm:$0xff]   ;;  %v3850_v61 = vld [vmem:[#allocation5 + $0x254] ss:$24 sps:$4 sm:$0xff]  }
 0x127   :  { %2193 = vmatprep.subr.bf16.mxu1 %v3775_v62  ;;  %v3848_v62 = vld [vmem:[#allocation5 + $0x250] ss:$24 sps:$4 sm:$0xff]  }
 0x129   :  { %2032 = vmatpush1.bf16.msra.mxu0 %v3770_v63  ;;  %v3853_v63 = vld [vmem:[#allocation5 + $0x284] ss:$24 sps:$4 sm:$0xff]  }
 0x12a   :  { %2194 = vmatpush1.bf16.msra.mxu1 %v3773_v1  ;;  %2033 = vmatprep.subr.bf16.mxu0 %v3778_v2  ;;  %v3851_v1 = vld [vmem:[#allocation5 + $0x280] ss:$24 sps:$4 sm:$0xff]   ;;  %v3856_v2 = vld [vmem:[#allocation5 + $0x2b4] ss:$24 sps:$4 sm:$0xff]  }
 0x12b   :  { %2195 = vmatprep.subr.bf16.mxu1 %v3781_v3  ;;  %v3854_v3 = vld [vmem:[#allocation5 + $0x2b0] ss:$24 sps:$4 sm:$0xff]  }
 0x12d   :  { %2034 = vmatpush1.bf16.msra.mxu0 %v3776_v4  ;;  %v3859_v4 = vld [vmem:[#allocation5 + $0x2e4] ss:$24 sps:$4 sm:$0xff]  }
 0x12e   :  { %2196 = vmatpush1.bf16.msra.mxu1 %v3779_v5  ;;  %2035 = vmatprep.subr.bf16.mxu0 %v3784_v6  ;;  %v3857_v5 = vld [vmem:[#allocation5 + $0x2e0] ss:$24 sps:$4 sm:$0xff]   ;;  %v3953_v6 = vld [vmem:[#allocation5 + $0x910] ss:$24 sps:$4 sm:$0xff]  }
 0x12f   :  { %2197 = vmatprep.subr.bf16.mxu1 %v3787_v7  ;;  %v3955_v7 = vld [vmem:[#allocation5 + $0x914] ss:$24 sps:$4 sm:$0xff]  }
 0x131   :  { %2036 = vmatpush1.bf16.msra.mxu0 %v3782_v8  ;;  %v3862_v8 = vld [vmem:[#allocation5 + $0x314] ss:$24 sps:$4 sm:$0xff]  }
 0x132   :  { %2198 = vmatpush1.bf16.msra.mxu1 %v3785_v11  ;;  %2037 = vmatprep.subr.bf16.mxu0 %v3790_v12  ;;  %v3860_v11 = vld [vmem:[#allocation5 + $0x310] ss:$24 sps:$4 sm:$0xff]   ;;  %v3865_v12 = vld [vmem:[#allocation5 + $0x344] ss:$24 sps:$4 sm:$0xff]  }
 0x133   :  { %2199 = vmatprep.subr.bf16.mxu1 %v3793_v13  ;;  %v3959_v13 = vld [vmem:[#allocation8 + $0x40] sm:$0xff]  }
 0x135   :  { %2038 = vmatpush1.bf16.msra.mxu0 %v3788_v14  ;;  %v3960_v14 = vld [vmem:[#allocation8] sm:$0xff]  }
 0x136   :  { %2200 = vmatpush1.bf16.msra.mxu1 %v3791_v15  ;;  %2039 = vmatprep.subr.bf16.mxu0 %v3796_v16  ;;  %v3961_v15 = vld [vmem:[#allocation8 + $0x48] sm:$0xff]  }
 0x137   :  { %2201 = vmatprep.subr.bf16.mxu1 %v3799_v17  ;;  %v3863_v16 = vld [vmem:[#allocation5 + $0x340] ss:$24 sps:$4 sm:$0xff]   ;;  %v3868_v17 = vld [vmem:[#allocation5 + $0x374] ss:$24 sps:$4 sm:$0xff]  }
 0x139   :  { %2040 = vmatpush1.bf16.msra.mxu0 %v3794_v19  ;;  %v3962_v19 = vld [vmem:[#allocation8 + $0x8] sm:$0xff]  }
 0x13a   :  { %2202 = vmatpush1.bf16.msra.mxu1 %v3797_v20  ;;  %2041 = vmatprep.subr.bf16.mxu0 %v3802_v21  ;;  %v3963_v20 = vld [vmem:[#allocation8 + $0x50] sm:$0xff]  }
 0x13b   :  { %2203 = vmatprep.subr.bf16.mxu1 %v3805_v22  ;;  %v3866_v21 = vld [vmem:[#allocation5 + $0x370] ss:$24 sps:$4 sm:$0xff]  }
 0x13c   :  { %v3965_v22 = vld [vmem:[#allocation8 + $0x58] sm:$0xff]  }
 0x13d   :  { %2042 = vmatpush1.bf16.msra.mxu0 %v3800_v23  ;;  %v3869_v23 = vld [vmem:[#allocation5 + $0x3a0] ss:$24 sps:$4 sm:$0xff]  }
 0x13e   :  { %2204 = vmatpush1.bf16.msra.mxu1 %v3803_v26  ;;  %2257 = vmatprep.subr.bf16.mxu0 %v3811_v28  ;;  %v3877_v26 = vld [vmem:[#allocation5 + $0x404] ss:$24 sps:$4 sm:$0xff]   ;;  %v3880_v28 = vld [vmem:[#allocation5 + $0x434] ss:$24 sps:$4 sm:$0xff]  }
 0x13f   :  { %2205 = vmatprep.subr.bf16.mxu1 %v3808_v27  ;;  %v3875_v27 = vld [vmem:[#allocation5 + $0x400] ss:$24 sps:$4 sm:$0xff]  }
 0x140   :  { %2044 = vmatmul.mubr.bf16.vlgmr.msra.gmra.mrb[0].mxu0 %v4376_v30 }
 0x141   :  { %2258 = vmatpush1.bf16.msra.mxu0 %v3809_v29  ;;  %2289 = vmatprep.mubr.bf16.mxu0 %v4356_v51  ;;  %v3827_v51 = vld [vmem:[#allocation5 + $0x100] ss:$24 sps:$4 sm:$0xff]   ;;  %v3966_v29 = vld [vmem:[#allocation8 + $0x18] sm:$0xff]  }
 0x142   :  { %2206 = vmatpush1.bf16.msra.mxu1 %v3806_v31  ;;  %2259 = vmatprep.subr.bf16.mxu0 %v3814_v32  ;;  %v3878_v31 = vld [vmem:[#allocation5 + $0x430] ss:$24 sps:$4 sm:$0xff]   ;;  %v3967_v32 = vld [vmem:[#allocation8 + $0x60] sm:$0xff]  }
 0x143   :  { %2216 = vmatprep.subr.bf16.mxu1 %v3820_v33  ;;  %v3883_v33 = vld [vmem:[#allocation5 + $0x464] ss:$24 sps:$4 sm:$0xff]  }
 0x145   :  { %2208 = vmatmul.mubr.bf16.vlgmr.msra.gmra.mrb[4].mxu1 %v4376_v30  ;;  %2260 = vmatpush1.bf16.msra.mxu0 %v3812_v34  ;;  %v3968_v34 = vld [vmem:[#allocation8 + $0x20] sm:$0xff]  }
 0x146   :  { %2261 = vmatprep.subr.bf16.mxu0 %v3817_v35  ;;  %2217 = vmatpush1.bf16.msra.mxu1 %v3818_v37  ;;  %v3881_v35 = vld [vmem:[#allocation5 + $0x460] ss:$24 sps:$4 sm:$0xff]  }
 0x147   :  { %2248 = vmatprep.mubr.bf16.mxu1 %v4223_v0  ;;  %2380 = vmatprep.subr.bf16.mxu1 %v3955_v7  ;;  %v3969_v37 = vld [vmem:[#allocation8 + $0x68] sm:$0xff]   ;;  %v3922_v7 = vld [vmem:[#allocation5 + $0x6d4] ss:$24 sps:$4 sm:$0xff]  }
 0x149   :  { %2262 = vmatpush1.bf16.msra.mxu0 %v3815_v38  ;;  %v3886_v38 = vld [vmem:[#allocation5 + $0x494] ss:$24 sps:$4 sm:$0xff]  }
 0x14a   :  { %2263 = vmatprep.subr.bf16.mxu0 %v3823_v39  ;;  %v3970_v39 = vld [vmem:[#allocation8 + $0x28] sm:$0xff]  }
 0x14d   :  { %2264 = vmatpush1.bf16.msra.mxu0 %v3821_v40  ;;  %v3884_v40 = vld [vmem:[#allocation5 + $0x490] ss:$24 sps:$4 sm:$0xff]  }
 0x14e   :  { %2265 = vmatprep.subr.bf16.mxu0 %v3826_v41  ;;  %v3971_v41 = vld [vmem:[#allocation8 + $0x70] sm:$0xff]  }
 0x151   :  { %3336 = vmatmul.mubr.msk.bf16.vlgmr.msra.gmra.mrb[4].mxu1 %vm1925_vm0, %v4352_v10  ;;  %2266 = vmatpush1.bf16.msra.mxu0 %v3824_v42  ;;  %v3889_v42 = vld [vmem:[#allocation5 + $0x4c4] ss:$24 sps:$4 sm:$0xff]  }
 0x152   :  { %2267 = vmatprep.subr.bf16.mxu0 %v3829_v43  ;;  %2412 = vmatprep.mubr.bf16.mxu1 %v4223_v0  ;;  %v3972_v43 = vld [vmem:[#allocation8 + $0x30] sm:$0xff]  }
 0x153   :  { %2381 = vmatpush1.bf16.msra.mxu1 %v3953_v6  ;;  %v3917_v6 = vld [vmem:[#allocation5 + $0x6a0] ss:$24 sps:$4 sm:$0xff]  }
 0x154   :  { %3392 = vmatprep.subr.bf16.mxu1 %v3959_v13  ;;  %v3931_v13 = vld [vmem:[#allocation5 + $0x764] ss:$24 sps:$4 sm:$0xff]  }
 0x155   :  { %2268 = vmatpush1.bf16.msra.mxu0 %v3827_v51  ;;  %v3887_v51 = vld [vmem:[#allocation5 + $0x4c0] ss:$24 sps:$4 sm:$0xff]  }
 0x156   :  { %2269 = vmatprep.subr.bf16.mxu0 %v3832_v44  ;;  %v3973_v44 = vld [vmem:[#allocation8 + $0x78] sm:$0xff]  }
 0x158   :  { %v4385_v49 = vpop.f32.mrb[0].mxu1 }
 0x159   :  { %2270 = vmatpush1.bf16.msra.mxu0 %v3830_v45  ;;  %v4387_v50 = vpop.f32.mrb[1].mxu1  ;;  %3337 = vmatmul.mubr.msk.bf16.vlgmr.msra.gmra.mrb[8].mxu1 %vm1925_vm0, %v4352_v10  ;;  %v3871_v10 = vld [vmem:[#allocation5 + $0x3a4] ss:$24 sps:$4 sm:$0xff]   ;;  %v3892_v45 = vld [vmem:[#allocation5 + $0x4f4] ss:$24 sps:$4 sm:$0xff]  }
 0x15a   :  { %2271 = vmatprep.subr.bf16.mxu0 %v3835_v46  ;;  %v2090_v52 = vpop.f32.mrb[2].mxu1  ;;  %3393 = vmatpush3.bf16.msra.mxu1 %v3960_v14  ;;  %v3974_v46 = vld [vmem:[#allocation8 + $0x38] sm:$0xff]   ;;  %v3929_v14 = vld [vmem:[#allocation5 + $0x760] ss:$24 sps:$4 sm:$0xff]  }
 0x15b   :  { %v2091_v53 = vpop.f32.mrb[3].mxu1  ;;  %3394 = vmatprep.subr.bf16.mxu1 %v3961_v15  ;;  %v3895_v52 = vld [vmem:[#allocation5 + $0x524] ss:$24 sps:$4 sm:$0xff]   ;;  %v3934_v15 = vld [vmem:[#allocation5 + $0x794] ss:$24 sps:$4 sm:$0xff]  }
 0x15c   :  { %v3893_v53 = vld [vmem:[#allocation5 + $0x520] ss:$24 sps:$4 sm:$0xff]  }
 0x15d   :  { %2272 = vmatpush1.bf16.msra.mxu0 %v3833_v47  ;;  %v3890_v47 = vld [vmem:[#allocation5 + $0x4f0] ss:$24 sps:$4 sm:$0xff]  }
 0x15e   :  { %2273 = vmatprep.subr.bf16.mxu0 %v3838_v48  ;;  %3395 = vmatpush3.bf16.msra.mxu1 %v3962_v19  ;;  %v3975_v48 = vld [vmem:[#allocation8 + $0xc0] sm:$0xff]  }
 0x15f   :  { %3396 = vmatprep.subr.bf16.mxu1 %v3963_v20  ;;  %v3935_v19 = vld [vmem:[#allocation5 + $0x7c0] ss:$24 sps:$4 sm:$0xff]   ;;  %v3940_v20 = vld [vmem:[#allocation5 + $0x7f4] ss:$24 sps:$4 sm:$0xff]  }
 0x161   :  { %2274 = vmatpush1.bf16.msra.mxu0 %v3836_v54  ;;  %v3898_v54 = vld [vmem:[#allocation5 + $0x554] ss:$24 sps:$4 sm:$0xff]  }
 0x162   :  { %2275 = vmatprep.subr.bf16.mxu0 %v3841_v55  ;;  %v3896_v55 = vld [vmem:[#allocation5 + $0x550] ss:$24 sps:$4 sm:$0xff]  }
 0x165   :  { %2276 = vmatpush1.bf16.msra.mxu0 %v3839_v56  ;;  %v3901_v56 = vld [vmem:[#allocation5 + $0x584] ss:$24 sps:$4 sm:$0xff]  }
 0x166   :  { %2277 = vmatprep.subr.bf16.mxu0 %v3844_v57  ;;  %v3899_v57 = vld [vmem:[#allocation5 + $0x580] ss:$24 sps:$4 sm:$0xff]  }
 0x169   :  { %2278 = vmatpush1.bf16.msra.mxu0 %v3842_v58  ;;  %v3904_v58 = vld [vmem:[#allocation5 + $0x5b4] ss:$24 sps:$4 sm:$0xff]  }
 0x16a   :  { %2279 = vmatprep.subr.bf16.mxu0 %v3847_v59  ;;  %v3902_v59 = vld [vmem:[#allocation5 + $0x5b0] ss:$24 sps:$4 sm:$0xff]  }
 0x16d   :  { %2280 = vmatpush1.bf16.msra.mxu0 %v3845_v60  ;;  %v3907_v60 = vld [vmem:[#allocation5 + $0x5e4] ss:$24 sps:$4 sm:$0xff]  }
 0x16e   :  { %2281 = vmatprep.subr.bf16.mxu0 %v3850_v61  ;;  %v3905_v61 = vld [vmem:[#allocation5 + $0x5e0] ss:$24 sps:$4 sm:$0xff]  }
 0x171   :  { %2282 = vmatpush1.bf16.msra.mxu0 %v3848_v62  ;;  %v3910_v62 = vld [vmem:[#allocation5 + $0x614] ss:$24 sps:$4 sm:$0xff]  }
 0x172   :  { %2283 = vmatprep.subr.bf16.mxu0 %v3853_v63  ;;  %v3908_v63 = vld [vmem:[#allocation5 + $0x610] ss:$24 sps:$4 sm:$0xff]  }
 0x175   :  { %2284 = vmatpush1.bf16.msra.mxu0 %v3851_v1  ;;  %v3913_v1 = vld [vmem:[#allocation5 + $0x644] ss:$24 sps:$4 sm:$0xff]  }
 0x176   :  { %2285 = vmatprep.subr.bf16.mxu0 %v3856_v2  ;;  %v3911_v2 = vld [vmem:[#allocation5 + $0x640] ss:$24 sps:$4 sm:$0xff]  }
 0x179   :  { %2286 = vmatpush1.bf16.msra.mxu0 %v3854_v3  ;;  %v3916_v3 = vld [vmem:[#allocation5 + $0x674] ss:$24 sps:$4 sm:$0xff]  }
 0x17a   :  { %2287 = vmatprep.subr.bf16.mxu0 %v3859_v4  ;;  %v3914_v4 = vld [vmem:[#allocation5 + $0x670] ss:$24 sps:$4 sm:$0xff]  }
 0x17d   :  { %2288 = vmatpush1.bf16.msra.mxu0 %v3857_v5  ;;  %v3919_v5 = vld [vmem:[#allocation5 + $0x6a4] ss:$24 sps:$4 sm:$0xff]  }
 0x17e   :  { %2298 = vmatprep.subr.bf16.mxu0 %v3862_v8  ;;  %v3920_v8 = vld [vmem:[#allocation5 + $0x6d0] ss:$24 sps:$4 sm:$0xff]  }
 0x180   :  { %2290 = vmatmul.mubr.bf16.vlgmr.msra.gmra.mrb[4].mxu0 %v4360_v9  ;;  %v3964_v9 = vld [vmem:[#allocation8 + $0x10] sm:$0xff]  }
 0x181   :  { %2299 = vmatpush1.bf16.msra.mxu0 %v3860_v11  ;;  %2330 = vmatprep.mubr.bf16.mxu0 %v4364_v36  ;;  %v3872_v36 = vld [vmem:[#allocation5 + $0x3d0] ss:$24 sps:$4 sm:$0xff]   ;;  %v3925_v11 = vld [vmem:[#allocation5 + $0x704] ss:$24 sps:$4 sm:$0xff]  }
 0x182   :  { %2300 = vmatprep.subr.bf16.mxu0 %v3865_v12  ;;  %3397 = vmatpush3.bf16.msra.mxu1 %v3964_v9  ;;  %v3928_v12 = vld [vmem:[#allocation5 + $0x734] ss:$24 sps:$4 sm:$0xff]   ;;  %v3941_v9 = vld [vmem:[#allocation5 + $0x820] ss:$24 sps:$4 sm:$0xff]  }
 0x183   :  { %3398 = vmatprep.subr.bf16.mxu1 %v3965_v22  ;;  %v3946_v22 = vld [vmem:[#allocation5 + $0x854] ss:$24 sps:$4 sm:$0xff]  }
 0x185   :  { %2301 = vmatpush1.bf16.msra.mxu0 %v3863_v16  ;;  %v3932_v16 = vld [vmem:[#allocation5 + $0x790] ss:$24 sps:$4 sm:$0xff]  }
 0x186   :  { %2302 = vmatprep.subr.bf16.mxu0 %v3868_v17  ;;  %3399 = vmatpush3.bf16.msra.mxu1 %v3966_v29  ;;  %v3937_v17 = vld [vmem:[#allocation5 + $0x7c4] ss:$24 sps:$4 sm:$0xff]   ;;  %v3956_v29 = vld [vmem:[#allocation5 + $0x8e0] ss:$24 sps:$4 sm:$0xff]  }
 0x187   :  { %3400 = vmatprep.subr.bf16.mxu1 %v3967_v32 }
 0x189   :  { %2303 = vmatpush1.bf16.msra.mxu0 %v3866_v21  ;;  %v3938_v21 = vld [vmem:[#allocation5 + $0x7f0] ss:$24 sps:$4 sm:$0xff]  }
 0x18a   :  { %2304 = vmatprep.subr.bf16.mxu0 %v3871_v10  ;;  %3401 = vmatpush3.bf16.msra.mxu1 %v3968_v34  ;;  %v3943_v10 = vld [vmem:[#allocation5 + $0x824] ss:$24 sps:$4 sm:$0xff]   ;;  %v4399_v34 = vld [vmem:[#allocation7] sm:$0x3f] }
 0x18b   :  { %3402 = vmatprep.subr.bf16.mxu1 %v3969_v37 }
 0x18d   :  { %2305 = vmatpush1.bf16.msra.mxu0 %v3869_v23  ;;  %v3944_v23 = vld [vmem:[#allocation5 + $0x850] ss:$24 sps:$4 sm:$0xff]  }
 0x18e   :  { %2306 = vmatprep.subr.bf16.mxu0 %v3874_v25  ;;  %3403 = vmatpush3.bf16.msra.mxu1 %v3970_v39  ;;  %v3949_v25 = vld [vmem:[#allocation5 + $0x884] ss:$24 sps:$4 sm:$0xff]  }
 0x18f   :  { %3404 = vmatprep.subr.bf16.mxu1 %v3971_v41 }
 0x191   :  { %2307 = vmatpush1.bf16.msra.mxu0 %v3872_v36  ;;  %v3947_v36 = vld [vmem:[#allocation5 + $0x880] ss:$24 sps:$4 sm:$0xff]  }
 0x192   :  { %2308 = vmatprep.subr.bf16.mxu0 %v3877_v26  ;;  %3405 = vmatpush3.bf16.msra.mxu1 %v3972_v43  ;;  %v3952_v26 = vld [vmem:[#allocation5 + $0x8b4] ss:$24 sps:$4 sm:$0xff]  }
 0x193   :  { %3406 = vmatprep.subr.bf16.mxu1 %v3973_v44 }
 0x195   :  { %2309 = vmatpush1.bf16.msra.mxu0 %v3875_v27  ;;  %v3950_v27 = vld [vmem:[#allocation5 + $0x8b0] ss:$24 sps:$4 sm:$0xff]  }
 0x196   :  { %2310 = vmatprep.subr.bf16.mxu0 %v3880_v28  ;;  %3407 = vmatpush3.bf16.msra.mxu1 %v3974_v46  ;;  %v3958_v28 = vld [vmem:[#allocation5 + $0x8e4] ss:$24 sps:$4 sm:$0xff]  }
 0x197   :  { %3414 = vmatprep.subr.bf16.mxu1 %v3975_v48 }
 0x199   :  { %2311 = vmatpush1.bf16.msra.mxu0 %v3878_v31  ;;  %v425_v31 = vlaneseq }
 0x19a   :  { %2312 = vmatprep.subr.bf16.mxu0 %v3883_v33 }
 0x19b   :  { %v4396_v32 = vshrl.u32 %v425_v31, 7 }
 0x19d   :  { %2313 = vmatpush1.bf16.msra.mxu0 %v3881_v35  ;;  %v427_v33 = vsub.s32 0, %v4396_v32  ;;  %v431_v35 = vsub.s32 1, %v4396_v32 }
 0x19e   :  { %2314 = vmatprep.subr.bf16.mxu0 %v3886_v38 }
 0x19f   :  { %v428_v37 = vrot.slane %v4399_v34, %v427_v33  ;;  %v432_v38 = vrot.slane %v4399_v34, %v431_v35  ;;  %v4224_v33 = vmov 0.0   ;;  %v443_v35 = vsub.s32 4, %v4396_v32 }
 0x1a1   :  { %2315 = vmatpush1.bf16.msra.mxu0 %v3884_v40 }
 0x1a2   :  { %2316 = vmatprep.subr.bf16.mxu0 %v3889_v42 }
 0x1a5   :  { %2317 = vmatpush1.bf16.msra.mxu0 %v3887_v51 }
 0x1a6   :  { %2318 = vmatprep.subr.bf16.mxu0 %v3892_v45  ;;  %v439_v45 = vsub.s32 3, %v4396_v32 }
 0x1a9   :  { %2319 = vmatpush1.bf16.msra.mxu0 %v3890_v47  ;;  %v440_v47 = vrot.slane %v4399_v34, %v439_v45 }
 0x1aa   :  { %2320 = vmatprep.subr.bf16.mxu0 %v3895_v52 }
 0x1ad   :  { %2321 = vmatpush1.bf16.msra.mxu0 %v3893_v53 }
 0x1ae   :  { %2322 = vmatprep.subr.bf16.mxu0 %v3898_v54  ;;  %v3976_v54 = vld [vmem:[#allocation8 + $0x80] sm:$0xff]  }
 0x1b1   :  { %2323 = vmatpush1.bf16.msra.mxu0 %v3896_v55 }
 0x1b2   :  { %2324 = vmatprep.subr.bf16.mxu0 %v3901_v56 }
 0x1b5   :  { %2325 = vmatpush1.bf16.msra.mxu0 %v3899_v57  ;;  %v3977_v57 = vld [vmem:[#allocation8 + $0xc8] sm:$0xff]  }
 0x1b6   :  { %2326 = vmatprep.subr.bf16.mxu0 %v3904_v58 }
 0x1b9   :  { %2327 = vmatpush1.bf16.msra.mxu0 %v3902_v59 }
 0x1ba   :  { %2328 = vmatprep.subr.bf16.mxu0 %v3907_v60  ;;  %v3979_v60 = vld [vmem:[#allocation8 + $0xd0] sm:$0xff]  }
 0x1bd   :  { %2329 = vmatpush1.bf16.msra.mxu0 %v3905_v61  ;;  %v435_v61 = vsub.s32 2, %v4396_v32 }
 0x1be   :  { %2339 = vmatprep.subr.bf16.mxu0 %v3910_v62  ;;  %v3980_v62 = vld [vmem:[#allocation8 + $0x90] sm:$0xff]  }
 0x1c0   :  { %2331 = vmatmul.mubr.bf16.vlgmr.msra.gmra.mrb[4].mxu0 %v4368_v18  ;;  %v3923_v18 = vld [vmem:[#allocation5 + $0x700] ss:$24 sps:$4 sm:$0xff]  }
 0x1c1   :  { %2340 = vmatpush1.bf16.msra.mxu0 %v3908_v63  ;;  %2371 = vmatprep.mubr.bf16.mxu0 %v4370_v24  ;;  %v3926_v24 = vld [vmem:[#allocation5 + $0x730] ss:$24 sps:$4 sm:$0xff]  }
 0x1c2   :  { %2341 = vmatprep.subr.bf16.mxu0 %v3913_v1  ;;  %v3981_v63 = vld [vmem:[#allocation8 + $0xd8] sm:$0xff]   ;;  %v436_v1 = vrot.slane %v4399_v34, %v435_v61 }
 0x1c5   :  { %2342 = vmatpush1.bf16.msra.mxu0 %v3911_v2  ;;  %v3982_v2 = vld [vmem:[#allocation8 + $0x98] sm:$0xff]  }
 0x1c6   :  { %2343 = vmatprep.subr.bf16.mxu0 %v3916_v3  ;;  %v3983_v3 = vld [vmem:[#allocation8 + $0xe0] sm:$0xff]  }
 0x1c9   :  { %2344 = vmatpush1.bf16.msra.mxu0 %v3914_v4 }
 0x1ca   :  { %2345 = vmatprep.subr.bf16.mxu0 %v3919_v5 }
 0x1cd   :  { %2346 = vmatpush1.bf16.msra.mxu0 %v3917_v6 }
 0x1ce   :  { %2347 = vmatprep.subr.bf16.mxu0 %v3922_v7  ;;  %v3984_v7 = vld [vmem:[#allocation8 + $0xa0] sm:$0xff]  }
 0x1d1   :  { %2348 = vmatpush1.bf16.msra.mxu0 %v3920_v8  ;;  %v3985_v8 = vld [vmem:[#allocation8 + $0xe8] sm:$0xff]  }
 0x1d2   :  { %2349 = vmatprep.subr.bf16.mxu0 %v3925_v11  ;;  %v3986_v11 = vld [vmem:[#allocation8 + $0xa8] sm:$0xff]  }
 0x1d5   :  { %2350 = vmatpush1.bf16.msra.mxu0 %v3923_v18  ;;  %v3987_v18 = vld [vmem:[#allocation8 + $0xf0] sm:$0xff]  }
 0x1d6   :  { %2351 = vmatprep.subr.bf16.mxu0 %v3928_v12  ;;  %v3988_v12 = vld [vmem:[#allocation8 + $0xb0] sm:$0xff]  }
 0x1d9   :  { %2352 = vmatpush1.bf16.msra.mxu0 %v3926_v24  ;;  %v3989_v24 = vld [vmem:[#allocation8 + $0xf8] sm:$0xff]  }
 0x1da   :  { %2353 = vmatprep.subr.bf16.mxu0 %v3931_v13  ;;  %v3990_v13 = vld [vmem:[#allocation8 + $0xb8] sm:$0xff]  }
 0x1dd   :  { %2354 = vmatpush1.bf16.msra.mxu0 %v3929_v14 }
 0x1de   :  { %2355 = vmatprep.subr.bf16.mxu0 %v3934_v15  ;;  %v3991_v15 = vld [vmem:[#allocation8 + $0x100] sm:$0xff]  }
 0x1e1   :  { %2356 = vmatpush1.bf16.msra.mxu0 %v3932_v16 }
 0x1e2   :  { %2357 = vmatprep.subr.bf16.mxu0 %v3937_v17  ;;  %v3992_v17 = vld [vmem:[#allocation8 + $0x108] sm:$0xff]  }
 0x1e5   :  { %2358 = vmatpush1.bf16.msra.mxu0 %v3935_v19  ;;  %v3993_v19 = vld [vmem:[#allocation8 + $0x110] sm:$0xff]  }
 0x1e6   :  { %2359 = vmatprep.subr.bf16.mxu0 %v3940_v20  ;;  %v3994_v20 = vld [vmem:[#allocation8 + $0x118] sm:$0xff]  }
 0x1e9   :  { %2360 = vmatpush1.bf16.msra.mxu0 %v3938_v21 }
 0x1ea   :  { %2361 = vmatprep.subr.bf16.mxu0 %v3943_v10  ;;  %v3995_v10 = vld [vmem:[#allocation8 + $0x120] sm:$0xff]  }
 0x1ed   :  { %2362 = vmatpush1.bf16.msra.mxu0 %v3941_v9 }
 0x1ee   :  { %2363 = vmatprep.subr.bf16.mxu0 %v3946_v22 }
 0x1f1   :  { %2364 = vmatpush1.bf16.msra.mxu0 %v3944_v23 }
 0x1f2   :  { %2365 = vmatprep.subr.bf16.mxu0 %v3949_v25  ;;  %v3996_v25 = vld [vmem:[#allocation8 + $0x128] sm:$0xff]  }
 0x1f5   :  { %2366 = vmatpush1.bf16.msra.mxu0 %v3947_v36  ;;  %v3997_v36 = vld [vmem:[#allocation8 + $0x130] sm:$0xff]  }
 0x1f6   :  { %2367 = vmatprep.subr.bf16.mxu0 %v3952_v26  ;;  %v3998_v26 = vld [vmem:[#allocation8 + $0x138] sm:$0xff]  }
 0x1f9   :  { %2368 = vmatpush1.bf16.msra.mxu0 %v3950_v27  ;;  %v3999_v27 = vld [vmem:[#allocation8 + $0x140] sm:$0xff]  }
 0x1fa   :  { %2369 = vmatprep.subr.bf16.mxu0 %v3958_v28  ;;  %v4000_v28 = vld [vmem:[#allocation8 + $0x148] sm:$0xff]  }
 0x1fd   :  { %2370 = vmatpush1.bf16.msra.mxu0 %v3956_v29  ;;  %v4001_v29 = vld [vmem:[#allocation8 + $0x150] ss:$0 sps:$4 sm:$0x33]  }
 0x1fe   :  { %v2786_v31 = vsel %vm2784_vm1, %v4001_v29, 0 }
 0x200   :  { %2372 = vmatmul.mubr.bf16.vlgmr.msra.gmra.mrb[4].mxu0 %v4376_v30 }
 0x213   :  { %v2045_v39 = vpop.f32.mrb[0].mxu0 }
 0x214   :  { %v3465_v40 = vadd.f32 %v2045_v39, %v428_v37  ;;  %v2047_v41 = vpop.f32.mrb[1].mxu0  ;;  %v447_v37 = vsub.s32 5, %v4396_v32 }
 0x215   :  { %v3467_v42 = vadd.f32 %v2047_v41, %v432_v38  ;;  %v2049_v43 = vpop.f32.mrb[2].mxu0  ;;  %v444_v38 = vrot.slane %v4399_v34, %v443_v35 }
 0x216   :  { %v3466_v30 = vadd.f32 %v3465_v40, %v4385_v49  ;;  %v2050_v51 = vpop.f32.mrb[3].mxu0  ;;  %v448_v39 = vrot.slane %v4399_v34, %v447_v37  ;;  %v4003_v34 = vld [vmem:[#allocation11 + $0x8] sm:$0xff]  }
 0x217   :  { %v3468_v44 = vadd.f32 %v3467_v42, %v4387_v50  ;;  %v3978_v50 = vld [vmem:[#allocation8 + $0x88] sm:$0xff]  }
 0x218   :  { %4010 = vtanh.f32 %v3466_v30 }
 0x219   :  { %4012 = vtanh.f32 %v3468_v44 }
 0x222   :  { %v4011_v46 = vpop.eup %4010 }
 0x223   :  { %v4013_v48 = vpop.eup %4012  ;;  %v2427_v55 = vpack.c.bf16 %v4011_v46, %v4011_v46 }
 0x224   :  { %v2250_v52 = vpop.f32.mrb[4].mxu1  ;;  %v2428_v53 = vpack.c.bf16 %v4013_v48, %v4013_v48  ;;  %v4002_v48 = vld [vmem:[#allocation11] sm:$0xff]  }
 0x225   :  { %v2252_v56 = vpop.f32.mrb[5].mxu1  ;;  %v3469_v6 = vadd.f32 %v2250_v52, %v436_v1  ;;  %v4004_v52 = vld [vmem:[#allocation11 + $0x10] sm:$0xff]  }
 0x226   :  { %v3470_v58 = vadd.f32 %v2252_v56, %v440_v47  ;;  %v2254_v59 = vpop.f32.mrb[6].mxu1  ;;  %2820 = vmatprep.mubr.bf16.mxu1 %v2428_v53  ;;  %v4005_v53 = vld [vmem:[#allocation11 + $0x18] sm:$0xff]  }
 0x227   :  { %v2255_v49 = vpop.f32.mrb[7].mxu1  ;;  %2821 = vmatmul.mubr.bf16.vlgmr.msra.gmra.mrb[12].mxu1 %v2427_v55  ;;  %v3338_v59 = vld [vmem:[#allocation10] ss:$0 sm:$0xff] }
 0x228   :  { %4014 = vtanh.f32 %v3470_v58  ;;  %3415 = vmatpush3.bf16.msra.mxu1 %v3976_v54 }
 0x229   :  { %3416 = vmatprep.subr.bf16.mxu1 %v3977_v57  ;;  %4016 = vtanh.f32 %v3469_v6 }
 0x22c   :  { %3417 = vmatpush3.bf16.msra.mxu1 %v3978_v50  ;;  %v2414_v21 = vpop.f32.mrb[8].mxu1 }
 0x22d   :  { %3418 = vmatprep.subr.bf16.mxu1 %v3979_v60  ;;  %v2416_v9 = vpop.f32.mrb[9].mxu1 }
 0x22e   :  { %v2418_v22 = vpop.f32.mrb[10].mxu1 }
 0x22f   :  { %v2419_v23 = vpop.f32.mrb[11].mxu1 }
 0x230   :  { %3419 = vmatpush3.bf16.msra.mxu1 %v3980_v62 }
 0x231   :  { %3420 = vmatprep.subr.bf16.mxu1 %v3981_v63 }
 0x232   :  { %v4015_v4 = vpop.eup %4014 }
 0x233   :  { %v2430_v5 = vpack.c.bf16 %v4015_v4, %v4015_v4  ;;  %v4017_v14 = vpop.eup %4016  ;;  %v4008_v4 = vld [vmem:[#allocation11 + $0x30] sm:$0xff]  }
 0x234   :  { %3421 = vmatpush3.bf16.msra.mxu1 %v3982_v2  ;;  %v2429_v16 = vpack.c.bf16 %v4017_v14, %v4017_v14  ;;  %v4006_v2 = vld [vmem:[#allocation11 + $0x20] sm:$0xff]  }
 0x235   :  { %2860 = vmatprep.mubr.bf16.mxu1 %v2430_v5  ;;  %3422 = vmatprep.subr.bf16.mxu1 %v3983_v3  ;;  %v4007_v3 = vld [vmem:[#allocation11 + $0x28] sm:$0xff]   ;;  %v4009_v5 = vld [vmem:[#allocation11 + $0x38] sm:$0xff]  }
 0x238   :  { %3423 = vmatpush3.bf16.msra.mxu1 %v3984_v7 }
 0x239   :  { %3424 = vmatprep.subr.bf16.mxu1 %v3985_v8 }
 0x23c   :  { %3425 = vmatpush3.bf16.msra.mxu1 %v3986_v11 }
 0x23d   :  { %3426 = vmatprep.subr.bf16.mxu1 %v3987_v18 }
 0x240   :  { %3427 = vmatpush3.bf16.msra.mxu1 %v3988_v12 }
 0x241   :  { %3428 = vmatprep.subr.bf16.mxu1 %v3989_v24 }
 0x244   :  { %3429 = vmatpush3.bf16.msra.mxu1 %v3990_v13  ;;  %v3383_v13 = vld [vmem:[#allocation13] ss:$0 sm:$0xff] }
 0x245   :  { %2868 = vmatprep.subr.bf16.mxu1 %v4223_v0 }
 0x247   :  { %2861 = vmatmul.mubr.bf16.vlgmr.msra.gmra.mrb[16].mxu1 %v2429_v16 }
 0x248   :  { %2869 = vmatpush1.bf16.msra.mxu1 %v3991_v15 }
 0x249   :  { %2870 = vmatprep.subr.bf16.mxu1 %v4223_v0 }
 0x24c   :  { %2871 = vmatpush1.bf16.msra.mxu1 %v3992_v17 }
 0x24d   :  { %2872 = vmatprep.subr.bf16.mxu1 %v4223_v0 }
 0x250   :  { %2873 = vmatpush1.bf16.msra.mxu1 %v3993_v19 }
 0x251   :  { %2874 = vmatprep.subr.bf16.mxu1 %v4223_v0 }
 0x254   :  { %2875 = vmatpush1.bf16.msra.mxu1 %v3994_v20 }
 0x255   :  { %2876 = vmatprep.subr.bf16.mxu1 %v4223_v0 }
 0x258   :  { %2877 = vmatpush1.bf16.msra.mxu1 %v3995_v10 }
 0x259   :  { %2878 = vmatprep.subr.bf16.mxu1 %v4223_v0 }
 0x25c   :  { %2879 = vmatpush1.bf16.msra.mxu1 %v3996_v25 }
 0x25d   :  { %2880 = vmatprep.subr.bf16.mxu1 %v4223_v0 }
 0x260   :  { %2881 = vmatpush1.bf16.msra.mxu1 %v3997_v36 }
 0x261   :  { %2882 = vmatprep.subr.bf16.mxu1 %v4223_v0 }
 0x264   :  { %2883 = vmatpush1.bf16.msra.mxu1 %v3998_v26 }
 0x265   :  { %2884 = vmatprep.subr.bf16.mxu1 %v4223_v0 }
 0x268   :  { %2885 = vmatpush1.bf16.msra.mxu1 %v3999_v27 }
 0x269   :  { %2886 = vmatprep.subr.bf16.mxu1 %v4223_v0 }
 0x26c   :  { %2887 = vmatpush1.bf16.msra.mxu1 %v4000_v28 }
 0x26d   :  { %2888 = vmatprep.subr.bf16.mxu1 %v4223_v0 }
 0x270   :  { %2889 = vmatpush1.bf16.msra.mxu1 %v2786_v31 }
 0x271   :  { %3445 = vmatprep.subr.bf16.mxu1 %v4224_v33 }
 0x2d3   :  { %v2373_v40 = vpop.f32.mrb[4].mxu0 }
 0x2d4   :  { %v3471_v41 = vadd.f32 %v2373_v40, %v444_v38  ;;  %v2375_v42 = vpop.f32.mrb[5].mxu0 }
 0x2d5   :  { %v3473_v43 = vadd.f32 %v2375_v42, %v448_v39  ;;  %v2377_v30 = vpop.f32.mrb[6].mxu0 }
 0x2d6   :  { %v3472_v51 = vadd.f32 %v3471_v41, %v2414_v21  ;;  %v2378_v44 = vpop.f32.mrb[7].mxu0 }
 0x2d7   :  { %v3474_v0 = vadd.f32 %v3473_v43, %v2416_v9 }
 0x2d8   :  { %4018 = vtanh.f32 %v3472_v51 }
 0x2d9   :  { %4020 = vtanh.f32 %v3474_v0 }
 0x2e2   :  { %v4019_v45 = vpop.eup %4018 }
 0x2e3   :  { %v4021_v46 = vpop.eup %4020  ;;  %v2431_v32 = vpack.c.bf16 %v4019_v45, %v4019_v45 }
 0x2e4   :  { %v2432_v47 = vpack.c.bf16 %v4021_v46, %v4021_v46 }
 0x2e6   :  { %3382 = vmatprep.mubr.msk.bf16.mxu1 %vm2780_vm2, %v2432_v47 }
 0x2e7   :  { %2901 = vmatmul.mubr.bf16.vlgmr.msra.gmra.mrb[20].mxu1 %v2431_v32 }
 0x2e8   :  { %3446 = vmatpush3.bf16.msra.mxu1 %v4002_v48  ;;  %3461 = vmatprep.mubr.msk.bf16.mxu1 %vm4225_vm3, %v4224_v33 }
 0x2e9   :  { %3447 = vmatprep.subr.bf16.mxu1 %v4224_v33 }
 0x2ec   :  { %3448 = vmatpush3.bf16.msra.mxu1 %v4003_v34 }
 0x2ed   :  { %3449 = vmatprep.subr.bf16.mxu1 %v4224_v33 }
 0x2f0   :  { %3450 = vmatpush3.bf16.msra.mxu1 %v4004_v52 }
 0x2f1   :  { %3451 = vmatprep.subr.bf16.mxu1 %v4224_v33 }
 0x2f4   :  { %3452 = vmatpush3.bf16.msra.mxu1 %v4005_v53 }
 0x2f5   :  { %3453 = vmatprep.subr.bf16.mxu1 %v4224_v33 }
 0x2f8   :  { %3454 = vmatpush3.bf16.msra.mxu1 %v4006_v2 }
 0x2f9   :  { %3455 = vmatprep.subr.bf16.mxu1 %v4224_v33 }
 0x2fa   :  { %v3408_v54 = vpop.f32.mrb[12].mxu1 }
 0x2fb   :  { %v3409_v55 = vpop.f32.mrb[13].mxu1 }
 0x2fc   :  { %v3410_v56 = vadd.f32 %v3409_v55, %v3408_v54  ;;  %v3411_v57 = vpop.f32.mrb[14].mxu1  ;;  %3456 = vmatpush3.bf16.msra.mxu1 %v4007_v3 }
 0x2fd   :  { %v3412_v58 = vpop.f32.mrb[15].mxu1  ;;  %3457 = vmatprep.subr.bf16.mxu1 %v4224_v33 }
 0x2fe   :  { %v2823_v60 = vadd.f32 %v3410_v56, %v3338_v59 }
 0x300   :  { %3458 = vmatpush3.bf16.msra.mxu1 %v4008_v4 }
 0x301   :  { %3459 = vmatprep.subr.bf16.mxu1 %v4224_v33 }
 0x304   :  { %3460 = vmatpush3.bf16.msra.mxu1 %v4009_v5 }
 0x31a   :  { %v3430_v49 = vpop.f32.mrb[16].mxu1 }
 0x31b   :  { %v3431_v50 = vpop.f32.mrb[17].mxu1 }
 0x31c   :  { %v3432_v61 = vadd.f32 %v3431_v50, %v3430_v49  ;;  %v3433_v62 = vpop.f32.mrb[18].mxu1 }
 0x31d   :  { %v3434_v63 = vpop.f32.mrb[19].mxu1 }
 0x31e   :  { %v2863_v1 = vadd.f32 %v3432_v61, %v2823_v60 }
 0x3ba   :  { %v2902_v6 = vpop.f32.mrb[20].mxu1 }
 0x3bb   :  { %v2903_v7 = vadd.f32 %v2902_v6, %v2863_v1  ;;  %v2904_v8 = vpop.f32.mrb[21].mxu1 }
 0x3bc   :  { %v2905_v11 = vpop.f32.mrb[22].mxu1 }
 0x3bd   :  { %4022 = vtanh.f32 %v2903_v7  ;;  %v2906_v18 = vpop.f32.mrb[23].mxu1 }
 0x3c7   :  { %v4023_v12 = vpop.eup %4022 }
 0x3c8   :  { %v2909_v24 = vpack.c.bf16 %v4023_v12, %v4023_v12 }
 0x3ca   :  { %3462 = vmatmul.mubr.bf16.vlgmr.msra.gmra.mrb[24].mxu1 %v2909_v24 }
 0x49d   :  { %v3015_v14 = vpop.f32.mrb[24].mxu1 }
 0x49e   :  { %v3016_v15 = vadd.f32 %v3383_v13, %v3015_v14  ;;  %v3463_v16 = vpop.f32.mrb[25].mxu1 }
 0x49f   :  { %v3018_v17 = vpop.f32.mrb[26].mxu1 }
 0x4a0   :  { %4024 = vtanh.f32 %v3016_v15  ;;  %v3464_v19 = vpop.f32.mrb[27].mxu1 }
 0x4aa   :  { %v4025_v20 = vpop.eup %4024 }
 0x4ab   :  { %3022 = vst [vmem:[#allocation14] sm:$0xff] %v4025_v20 }
 0x4ac   :  { %4191 = shalt.err (!%p4188_p4)
}
 0x4ad   :  { %s4192_s15 = scalar_lea.hbm %s4444_s7, 128 }
 0x4ae   :  { %p4193_p5 = scmp.ne.s32.totalorder %s4444_s7, %s4192_s15  ;;  %p4196_p6 = scmp.lt.u32.totalorder %s4192_s15, %s4444_s7 }
 0x4b0   :  { %p4198_p7 = pnand %p4196_p6, %p4193_p5 }
 0x4b2   :  { %4201 = shalt.err (!%p4198_p7)
}
 0x4b3   :  { %3032 = dma.vmem_to_hbm [thread:$0]  %s3030_s13, 128, %s4444_s7, [#allocation4]  }
 0x4b4   :  { %4210 = dma.done.wait [#allocation4], 128  }
 0x4b5   :  { %4211 = vsyncadd [#allocation4], 4294967168 }
 0x4b6   :  { %3036 = vsyncpa [#allocation3], 1 }
 0x4b7   :  { %3037 = vsyncpa [#allocation6], 1 }
 0x4b8   :  { %3038 = vsyncpa [#allocation9], 1 }
 0x4b9   :  { %3039 = vsyncpa [#allocation12], 1 }
 0x4ba   :  { %3040 = vsyncpa [#allocation4], 1 }

</bundles_post_ra>
